<compile_context>
chip_gen: v5e
topology: v5e:2x2
jax: 0.10.0
libtpu: 0.0.40
codegen_flags: <defaults>
</compile_context>

<pallas_src>
import jax
import jax.numpy as jnp
from jax import lax
from jax.experimental import pallas as pl
from jax.experimental.pallas import tpu as pltpu

# ---- hyperparameters mirroring the PyTorch module ----
CONV_CHANNELS = 6
HIDDEN_SIZE = 32
INPUT_SIZE = 6
KERNEL_SIZE = 2
POOL_SIZE = 2
OUT_SIZE = 1

CC_PAD = 8       # conv channels padded to one sublane group (rows 6,7 are zero)
OUT_ROWS = 8     # linear-head rows padded to one sublane group (row 0 is real)
GX_CHUNK = 16    # pooled steps per gx matmul chunk (bounds f32 temporaries)


def _round_up(n, m):
    return ((n + m - 1) // m) * m


def _cdiv(a, b):
    return -(-a // b)


def cnn_lstm_kernel(xe_ref, xo_ref, wc_ref, cb_ref, wih_ref, whh_ref,
                    lstmb_ref, linw_ref, linb_ref, out_ref, gx_ref):
    """One batch tile, batch-on-lanes.

    xe_ref : (F, (Lp+1)*Bt) bf16   even timesteps x[2s],  lanes ordered (s, b)
    xo_ref : (F,  Lp   *Bt) bf16   odd  timesteps x[2s+1]
    gx_ref : (Lp, 4H, Bt)   bf16 scratch: per-step input+bias gate pre-acts
    out_ref: (OUT_ROWS, Bt) f32    row 0 = real output
    """
    Lp, _, Bt = gx_ref.shape
    H = HIDDEN_SIZE
    n = Lp * Bt

    # ---- Conv1d(K=2): one lane-dense 2-D MXU matmul per time-parity --------
    # wc rows [0:Cc]          = W[:, :, 0]   (tap k=0)
    #    rows [CC_PAD:+Cc]    = W[:, :, 1]   (tap k=1)  -> sublane-aligned blocks
    ye = jnp.dot(wc_ref[...], xe_ref[...], preferred_element_type=jnp.float32)
    yo = jnp.dot(wc_ref[...], xo_ref[...], preferred_element_type=jnp.float32)
    # conv[2s]   = W0 @ x[2s]   + W1 @ x[2s+1]
    # conv[2s+1] = W0 @ x[2s+1] + W1 @ x[2s+2]
    conv_ev = ye[0:CC_PAD, 0:n] + yo[CC_PAD:2 * CC_PAD, 0:n]
    conv_od = yo[0:CC_PAD, 0:n] + ye[CC_PAD:2 * CC_PAD, Bt:Bt + n]
    # MaxPool1d(2) + bias + ReLU (max/relu commute; bias is shared).
    pooled = jnp.maximum(jnp.maximum(conv_ev, conv_od) + cb_ref[...], 0.0)
    pooled = pooled.astype(jnp.bfloat16)                        # (8, Lp*Bt)

    # ---- Input->gate pre-activations for all steps (chunked 2-D matmuls) ---
    wih = wih_ref[...]                                          # (4H, 8) bf16
    lstm_b = lstmb_ref[...]                                     # (4H, 1) f32
    for cstart in range(0, Lp, GX_CHUNK):
        cs = min(GX_CHUNK, Lp - cstart)
        gxc = jnp.dot(wih, pooled[:, cstart * Bt:(cstart + cs) * Bt],
                      preferred_element_type=jnp.float32) + lstm_b
        gxc = gxc.astype(jnp.bfloat16)                          # (4H, cs*Bt)
        for s in range(cs):                                     # aligned lane slices
            gx_ref[cstart + s] = gxc[:, s * Bt:(s + 1) * Bt]

    # ---- LSTM recurrence: one (4H,H)@(H,Bt) matmul per step, f32 gate math -
    w_hh = whh_ref[...]                                         # (4H, H) bf16, hoisted

    def step(t, carry):
        h, c = carry                                            # (H, Bt) f32
        pre = (jnp.dot(w_hh, h.astype(jnp.bfloat16),
                       preferred_element_type=jnp.float32)
               + gx_ref[t].astype(jnp.float32))                 # (4H, Bt)
        i_g = jax.nn.sigmoid(pre[0 * H:1 * H])                  # sublane-aligned
        f_g = jax.nn.sigmoid(pre[1 * H:2 * H])                  # PyTorch i,f,g,o order
        g_g = jnp.tanh(pre[2 * H:3 * H])
        o_g = jax.nn.sigmoid(pre[3 * H:4 * H])
        c = f_g * c + i_g * g_g
        h = o_g * jnp.tanh(c)
        return h, c

    h_init = jnp.zeros((H, Bt), jnp.float32)
    c_init = jnp.zeros((H, Bt), jnp.float32)
    h, _ = lax.fori_loop(0, Lp, step, (h_init, c_init), unroll=min(4, Lp))

    # ---- Linear head (row 0 real; rows 1..7 are zero padding) --------------
    out = jnp.dot(linw_ref[...], h.astype(jnp.bfloat16),
                  preferred_element_type=jnp.float32) + linb_ref[...]
    out_ref[...] = out.astype(out_ref.dtype)


def init_params(key):
    """Deterministic synthetic parameters shaped like the PyTorch module."""
    ks = jax.random.split(key, 8)
    s = 0.1
    conv_w_t = s * jax.random.normal(ks[0], (CONV_CHANNELS, INPUT_SIZE, KERNEL_SIZE), jnp.float32)
    conv_b_t = s * jax.random.normal(ks[1], (CONV_CHANNELS,), jnp.float32)
    w_ih_t = s * jax.random.normal(ks[2], (4 * HIDDEN_SIZE, CONV_CHANNELS), jnp.float32)
    w_hh_t = s * jax.random.normal(ks[3], (4 * HIDDEN_SIZE, HIDDEN_SIZE), jnp.float32)
    b_ih = s * jax.random.normal(ks[4], (4 * HIDDEN_SIZE,), jnp.float32)
    b_hh = s * jax.random.normal(ks[5], (4 * HIDDEN_SIZE,), jnp.float32)
    lin_w_t = s * jax.random.normal(ks[6], (OUT_SIZE, HIDDEN_SIZE), jnp.float32)
    lin_b_t = s * jax.random.normal(ks[7], (OUT_SIZE,), jnp.float32)

    # ---- kernel layouts: weight-on-the-left, sublane-padded rows, bf16 MXU
    #      operands, f32 biases ----
    wc = jnp.zeros((KERNEL_SIZE * CC_PAD, INPUT_SIZE), jnp.float32)
    for k in range(KERNEL_SIZE):
        wc = wc.at[k * CC_PAD:k * CC_PAD + CONV_CHANNELS, :].set(conv_w_t[:, :, k])
    wc = wc.astype(jnp.bfloat16)                                        # (16, F)
    cb = jnp.zeros((CC_PAD, 1), jnp.float32).at[:CONV_CHANNELS, 0].set(conv_b_t)
    wih = (jnp.zeros((4 * HIDDEN_SIZE, CC_PAD), jnp.float32)
           .at[:, :CONV_CHANNELS].set(w_ih_t).astype(jnp.bfloat16))     # (4H, 8)
    whh = w_hh_t.astype(jnp.bfloat16)                                   # (4H, H)
    lstm_b = (b_ih + b_hh).reshape(4 * HIDDEN_SIZE, 1)                  # (4H, 1)
    linw = (jnp.zeros((OUT_ROWS, HIDDEN_SIZE), jnp.float32)
            .at[:OUT_SIZE, :].set(lin_w_t).astype(jnp.bfloat16))        # (8, H)
    linb = jnp.zeros((OUT_ROWS, 1), jnp.float32).at[:OUT_SIZE, 0].set(lin_b_t)

    torch_like = dict(conv_w=conv_w_t, conv_b=conv_b_t, w_ih=w_ih_t, w_hh=w_hh_t,
                      b_ih=b_ih, b_hh=b_hh, lin_w=lin_w_t, lin_b=lin_b_t)
    kernel_params = (wc, cb, wih, whh, lstm_b, linw, linb)
    return kernel_params, torch_like


def cnn_lstm_forward(x, kernel_params, *, b_tile=256, min_grid=1):
    """x: (B, T, F) float. Returns (B, OUT_SIZE) float32.

    b_tile  : max batch-lane tile (multiple of 128). 256 fills the 256-wide MXU
              on v6e/v7x; 128 already saturates v5e's 4x128^2 MXU.
    min_grid: set to 2 on v7x (when B > 128) so the 'parallel' grid axis can be
              sharded across its two TensorCores.
    """
    B, T, F = x.shape
    assert F == INPUT_SIZE
    assert KERNEL_SIZE == 2 and POOL_SIZE == 2, "even/odd conv+pool fusion assumes K=P=2"
    Lc = T - KERNEL_SIZE + 1
    Lp = Lc // POOL_SIZE
    assert Lp >= 1, "sequence too short for conv + pool"

    # Adaptive batch tiling: minimize padding, keep lanes dense (mult. of 128).
    ntiles = max(_cdiv(B, b_tile), min_grid)
    bt = _round_up(_cdiv(B, ntiles), 128)
    B_pad = ntiles * bt

    # Batch-on-lanes, even/odd time split (covers each x[t] exactly once):
    #   xe[i, f, s*bt + j] = x[i*bt+j, 2s,   f]   s in [0, Lp]
    #   xo[i, f, s*bt + j] = x[i*bt+j, 2s+1, f]   s in [0, Lp)
    xt = jnp.transpose(x, (2, 1, 0)).astype(jnp.bfloat16)       # (F, T, B)
    if B_pad != B:
        xt = jnp.pad(xt, ((0, 0), (0, 0), (0, B_pad - B)))

    def split_tiles(a):   # (F, S, B_pad) -> (ntiles, F, S*bt)
        S = a.shape[1]
        return (a.reshape(F, S, ntiles, bt).transpose(2, 0, 1, 3)
                 .reshape(ntiles, F, S * bt))

    xe = split_tiles(xt[:, 0:2 * Lp + 1:2, :])                  # (ntiles, F, (Lp+1)*bt)
    xo = split_tiles(xt[:, 1:2 * Lp:2, :])                      # (ntiles, F, Lp*bt)

    wc, cb, wih, whh, lstm_b, linw, linb = kernel_params

    def resident(a):      # tiny weights: full block, resident across the grid
        return pl.BlockSpec(a.shape, lambda i: (0,) * a.ndim)

    grid_spec = pltpu.PrefetchScalarGridSpec(
        num_scalar_prefetch=0,
        grid=(ntiles,),
        in_specs=[
            pl.BlockSpec((None, F, (Lp + 1) * bt), lambda i: (i, 0, 0)),
            pl.BlockSpec((None, F, Lp * bt), lambda i: (i, 0, 0)),
            resident(wc), resident(cb), resident(wih), resident(whh),
            resident(lstm_b), resident(linw), resident(linb),
        ],
        out_specs=pl.BlockSpec((OUT_ROWS, bt), lambda i: (0, i)),
        scratch_shapes=[pltpu.VMEM((Lp, 4 * HIDDEN_SIZE, bt), jnp.bfloat16)],
    )

    # VMEM budget: double-buffered bf16 inputs + bf16 gx scratch + f32 conv
    # temporaries (dominant for long T; re-derive for v7x's 64 MiB).
    est = (4 * F * (2 * Lp + 1) * bt * 2                       # inputs, 2 buffers
           + Lp * 4 * HIDDEN_SIZE * bt * 2                     # gx scratch (bf16)
           + 8 * 2 * CC_PAD * (Lp + 1) * bt * 4                # conv/pool f32 temps
           + 4 * HIDDEN_SIZE * min(GX_CHUNK, Lp) * bt * 4      # gx f32 chunk
           + (2 << 20))
    vmem_limit = int(min(max(est, 32 << 20), 64 << 20))

    out_pad = pl.pallas_call(
        cnn_lstm_kernel,
        out_shape=jax.ShapeDtypeStruct((OUT_ROWS, B_pad), jnp.float32),
        grid_spec=grid_spec,
        compiler_params=pltpu.CompilerParams(
            dimension_semantics=("parallel",),
            vmem_limit_bytes=vmem_limit),
    )(xe, xo, wc, cb, wih, whh, lstm_b, linw, linb)
    return jnp.transpose(out_pad[:OUT_SIZE, :B])                # (B, OUT_SIZE)


def reference_forward(x, p):
    """Pure-JAX mirror of the PyTorch forward (mc_dropout=False) using the same
    mixed precision as the kernel: bf16 matmul operands, f32 accumulation."""
    bf = lambda a: a.astype(jnp.bfloat16)
    B, T, F = x.shape
    Lc = T - KERNEL_SIZE + 1
    Lp = Lc // POOL_SIZE
    H = HIDDEN_SIZE

    xb = bf(x)
    acc = jnp.zeros((B, Lc, CONV_CHANNELS), jnp.float32)
    for k in range(KERNEL_SIZE):
        acc = acc + lax.dot_general(
            xb[:, k:k + Lc, :], jnp.transpose(bf(p["conv_w"][:, :, k])),
            (((2,), (0,)), ((), ())), preferred_element_type=jnp.float32)
    conv = jax.nn.relu(acc + p["conv_b"][None, None, :])
    pooled = conv[:, :Lp * POOL_SIZE, :].reshape(B, Lp, POOL_SIZE, CONV_CHANNELS).max(axis=2)

    w_ih = bf(p["w_ih"])
    w_hh = bf(p["w_hh"])
    bias = p["b_ih"] + p["b_hh"]
    h = jnp.zeros((B, H), jnp.float32)
    c = jnp.zeros((B, H), jnp.float32)
    for t in range(Lp):
        gates = (jnp.dot(bf(pooled[:, t, :]), jnp.transpose(w_ih),
                         preferred_element_type=jnp.float32)
                 + jnp.dot(bf(h), jnp.transpose(w_hh),
                           preferred_element_type=jnp.float32) + bias)
        i_g = jax.nn.sigmoid(gates[:, 0:H])
        f_g = jax.nn.sigmoid(gates[:, H:2 * H])
        g_g = jnp.tanh(gates[:, 2 * H:3 * H])
        o_g = jax.nn.sigmoid(gates[:, 3 * H:4 * H])
        c = f_g * c + i_g * g_g
        h = o_g * jnp.tanh(c)
    return jnp.dot(bf(h), jnp.transpose(bf(p["lin_w"])),
                   preferred_element_type=jnp.float32) + p["lin_b"]


if __name__ == "__main__":
    key = jax.random.PRNGKey(0)
    k_x, k_p = jax.random.split(key)
    B, T = 2, 8                                    # batch=2, seq=8, features=6
    x = jax.random.normal(k_x, (B, T, INPUT_SIZE), jnp.float32)

    kernel_params, torch_like = init_params(k_p)

    out = jax.jit(cnn_lstm_forward)(x, kernel_params)
    out = jax.block_until_ready(out)

    ref = reference_forward(x, torch_like)
    assert out.shape == (B, OUT_SIZE)
    # 3e-3: kernel additionally stores the precomputed gate pre-activations in
    # bf16 (v7x VMEM saving); expected output deviation is ~1e-4.
    assert jnp.allclose(out, ref, atol=3e-3, rtol=3e-3), (out, ref)
    print("KERNEL_OK")
</pallas_src>

<mosaic_0001>
module attributes {stable_mosaic.version = 11 : i64} {
  func.func @cnn_lstm_kernel(%arg0: i32, %arg1: memref<1x6x512xbf16, #tpu.memory_space<vmem>>, %arg2: memref<1x6x384xbf16, #tpu.memory_space<vmem>>, %arg3: memref<16x6xbf16, #tpu.memory_space<vmem>>, %arg4: memref<8x1xf32, #tpu.memory_space<vmem>>, %arg5: memref<128x8xbf16, #tpu.memory_space<vmem>>, %arg6: memref<128x32xbf16, #tpu.memory_space<vmem>>, %arg7: memref<128x1xf32, #tpu.memory_space<vmem>>, %arg8: memref<8x32xbf16, #tpu.memory_space<vmem>>, %arg9: memref<8x1xf32, #tpu.memory_space<vmem>>, %arg10: memref<8x128xf32, #tpu.memory_space<vmem>>, %arg11: memref<3x128x128xbf16, #tpu.memory_space<vmem>>) attributes {dimension_semantics = [#tpu.dimension_semantics<parallel>], iteration_bounds = array<i64: 1>, scalar_prefetch = 0 : i64, scratch_operands = 1 : i64, tpu.core_type = #tpu.core_type<tc>, window_params = [{transform_indices = @transform_0, window_bounds = array<i64: 1, 6, 512>}, {transform_indices = @transform_1, window_bounds = array<i64: 1, 6, 384>}, {pipeline_mode = #tpu.pipeline_mode<synchronous>, transform_indices = @transform_2, window_bounds = array<i64: 16, 6>}, {pipeline_mode = #tpu.pipeline_mode<synchronous>, transform_indices = @transform_3, window_bounds = array<i64: 8, 1>}, {pipeline_mode = #tpu.pipeline_mode<synchronous>, transform_indices = @transform_4, window_bounds = array<i64: 128, 8>}, {pipeline_mode = #tpu.pipeline_mode<synchronous>, transform_indices = @transform_5, window_bounds = array<i64: 128, 32>}, {pipeline_mode = #tpu.pipeline_mode<synchronous>, transform_indices = @transform_6, window_bounds = array<i64: 128, 1>}, {pipeline_mode = #tpu.pipeline_mode<synchronous>, transform_indices = @transform_7, window_bounds = array<i64: 8, 32>}, {pipeline_mode = #tpu.pipeline_mode<synchronous>, transform_indices = @transform_8, window_bounds = array<i64: 8, 1>}, {transform_indices = @transform_9, window_bounds = array<i64: 8, 128>}]} {
    %c0 = arith.constant 0 : index
    %c0_0 = arith.constant 0 : index
    %0 = vector.load %arg3[%c0, %c0_0] : memref<16x6xbf16, #tpu.memory_space<vmem>>, vector<16x6xbf16>
    %c0_1 = arith.constant 0 : index
    %c0_2 = arith.constant 0 : index
    %c0_3 = arith.constant 0 : index
    %1 = vector.load %arg1[%c0_1, %c0_2, %c0_3] : memref<1x6x512xbf16, #tpu.memory_space<vmem>>, vector<1x6x512xbf16>
    %2 = vector.shape_cast %1 : vector<1x6x512xbf16> to vector<6x512xbf16>
    %cst = arith.constant dense<0.000000e+00> : vector<16x512xf32>
    %3 = tpu.matmul %0, %2, %cst {dimension_numbers = #tpu.dot_dimension_numbers<[1], [0], [0], [1], [0, 0, 1, 1], [], []>} : vector<16x6xbf16>, vector<6x512xbf16>, vector<16x512xf32> -> vector<16x512xf32>
    %c0_4 = arith.constant 0 : index
    %c0_5 = arith.constant 0 : index
    %4 = vector.load %arg3[%c0_4, %c0_5] : memref<16x6xbf16, #tpu.memory_space<vmem>>, vector<16x6xbf16>
    %c0_6 = arith.constant 0 : index
    %c0_7 = arith.constant 0 : index
    %c0_8 = arith.constant 0 : index
    %5 = vector.load %arg2[%c0_6, %c0_7, %c0_8] : memref<1x6x384xbf16, #tpu.memory_space<vmem>>, vector<1x6x384xbf16>
    %6 = vector.shape_cast %5 : vector<1x6x384xbf16> to vector<6x384xbf16>
    %cst_9 = arith.constant dense<0.000000e+00> : vector<16x384xf32>
    %7 = tpu.matmul %4, %6, %cst_9 {dimension_numbers = #tpu.dot_dimension_numbers<[1], [0], [0], [1], [0, 0, 1, 1], [], []>} : vector<16x6xbf16>, vector<6x384xbf16>, vector<16x384xf32> -> vector<16x384xf32>
    %8 = vector.extract_strided_slice %3 {offsets = [0, 0], sizes = [8, 384], strides = [1, 1]} : vector<16x512xf32> to vector<8x384xf32>
    %9 = vector.extract_strided_slice %7 {offsets = [8, 0], sizes = [8, 384], strides = [1, 1]} : vector<16x384xf32> to vector<8x384xf32>
    %10 = arith.addf %8, %9 : vector<8x384xf32>
    %11 = vector.extract_strided_slice %7 {offsets = [0, 0], sizes = [8, 384], strides = [1, 1]} : vector<16x384xf32> to vector<8x384xf32>
    %12 = vector.extract_strided_slice %3 {offsets = [8, 128], sizes = [8, 384], strides = [1, 1]} : vector<16x512xf32> to vector<8x384xf32>
    %13 = arith.addf %11, %12 : vector<8x384xf32>
    %14 = arith.maximumf %10, %13 : vector<8x384xf32>
    %c0_10 = arith.constant 0 : index
    %c0_11 = arith.constant 0 : index
    %15 = vector.load %arg4[%c0_10, %c0_11] : memref<8x1xf32, #tpu.memory_space<vmem>>, vector<8x1xf32>
    %16 = vector.broadcast %15 : vector<8x1xf32> to vector<8x384xf32>
    %17 = arith.addf %14, %16 : vector<8x384xf32>
    %cst_12 = arith.constant 0.000000e+00 : f32
    %18 = vector.broadcast %cst_12 : f32 to vector<8x384xf32>
    %19 = arith.maximumf %17, %18 : vector<8x384xf32>
    %20 = arith.truncf %19 : vector<8x384xf32> to vector<8x384xbf16>
    %c0_13 = arith.constant 0 : index
    %c0_14 = arith.constant 0 : index
    %21 = vector.load %arg5[%c0_13, %c0_14] : memref<128x8xbf16, #tpu.memory_space<vmem>>, vector<128x8xbf16>
    %c0_15 = arith.constant 0 : index
    %c0_16 = arith.constant 0 : index
    %22 = vector.load %arg7[%c0_15, %c0_16] : memref<128x1xf32, #tpu.memory_space<vmem>>, vector<128x1xf32>
    %cst_17 = arith.constant dense<0.000000e+00> : vector<128x384xf32>
    %23 = tpu.matmul %21, %20, %cst_17 {dimension_numbers = #tpu.dot_dimension_numbers<[1], [0], [0], [1], [0, 0, 1, 1], [], []>} : vector<128x8xbf16>, vector<8x384xbf16>, vector<128x384xf32> -> vector<128x384xf32>
    %24 = vector.broadcast %22 : vector<128x1xf32> to vector<128x384xf32>
    %25 = arith.addf %23, %24 : vector<128x384xf32>
    %26 = arith.truncf %25 : vector<128x384xf32> to vector<128x384xbf16>
    %27 = vector.extract_strided_slice %26 {offsets = [0, 0], sizes = [128, 128], strides = [1, 1]} : vector<128x384xbf16> to vector<128x128xbf16>
    %c0_18 = arith.constant 0 : index
    %c0_19 = arith.constant 0 : index
    %c0_20 = arith.constant 0 : index
    %28 = vector.load %arg11[%c0_18, %c0_19, %c0_20] : memref<3x128x128xbf16, #tpu.memory_space<vmem>>, vector<1x128x128xbf16>
    %29 = vector.shape_cast %28 : vector<1x128x128xbf16> to vector<128x128xbf16>
    %30 = vector.shape_cast %27 : vector<128x128xbf16> to vector<1x128x128xbf16>
    tpu.vector_store %arg11[%c0_18, %c0_19, %c0_20], %30 {strides = array<i32>} : memref<3x128x128xbf16, #tpu.memory_space<vmem>>, vector<1x128x128xbf16>,
    %31 = vector.extract_strided_slice %26 {offsets = [0, 128], sizes = [128, 128], strides = [1, 1]} : vector<128x384xbf16> to vector<128x128xbf16>
    %c1 = arith.constant 1 : index
    %c0_21 = arith.constant 0 : index
    %c0_22 = arith.constant 0 : index
    %32 = vector.load %arg11[%c1, %c0_21, %c0_22] : memref<3x128x128xbf16, #tpu.memory_space<vmem>>, vector<1x128x128xbf16>
    %33 = vector.shape_cast %32 : vector<1x128x128xbf16> to vector<128x128xbf16>
    %34 = vector.shape_cast %31 : vector<128x128xbf16> to vector<1x128x128xbf16>
    tpu.vector_store %arg11[%c1, %c0_21, %c0_22], %34 {strides = array<i32>} : memref<3x128x128xbf16, #tpu.memory_space<vmem>>, vector<1x128x128xbf16>,
    %35 = vector.extract_strided_slice %26 {offsets = [0, 256], sizes = [128, 128], strides = [1, 1]} : vector<128x384xbf16> to vector<128x128xbf16>
    %c2 = arith.constant 2 : index
    %c0_23 = arith.constant 0 : index
    %c0_24 = arith.constant 0 : index
    %36 = vector.load %arg11[%c2, %c0_23, %c0_24] : memref<3x128x128xbf16, #tpu.memory_space<vmem>>, vector<1x128x128xbf16>
    %37 = vector.shape_cast %36 : vector<1x128x128xbf16> to vector<128x128xbf16>
    %38 = vector.shape_cast %35 : vector<128x128xbf16> to vector<1x128x128xbf16>
    tpu.vector_store %arg11[%c2, %c0_23, %c0_24], %38 {strides = array<i32>} : memref<3x128x128xbf16, #tpu.memory_space<vmem>>, vector<1x128x128xbf16>,
    %c0_25 = arith.constant 0 : index
    %c0_26 = arith.constant 0 : index
    %39 = vector.load %arg6[%c0_25, %c0_26] : memref<128x32xbf16, #tpu.memory_space<vmem>>, vector<128x32xbf16>
    %cst_27 = arith.constant 0.000000e+00 : f32
    %40 = vector.broadcast %cst_27 : f32 to vector<32x128xf32>
    %cst_28 = arith.constant 0.000000e+00 : f32
    %41 = vector.broadcast %cst_28 : f32 to vector<32x128xf32>
    %c0_i32 = arith.constant 0 : i32
    %42 = arith.truncf %40 : vector<32x128xf32> to vector<32x128xbf16>
    %cst_29 = arith.constant dense<0.000000e+00> : vector<128x128xf32>
    %43 = tpu.matmul %39, %42, %cst_29 {dimension_numbers = #tpu.dot_dimension_numbers<[1], [0], [0], [1], [0, 0, 1, 1], [], []>} : vector<128x32xbf16>, vector<32x128xbf16>, vector<128x128xf32> -> vector<128x128xf32>
    %44 = arith.index_cast %c0_i32 : i32 to index
    %c0_30 = arith.constant 0 : index
    %c0_31 = arith.constant 0 : index
    %45 = vector.load %arg11[%44, %c0_30, %c0_31] : memref<3x128x128xbf16, #tpu.memory_space<vmem>>, vector<1x128x128xbf16>
    %46 = vector.shape_cast %45 : vector<1x128x128xbf16> to vector<128x128xbf16>
    %47 = arith.extf %46 : vector<128x128xbf16> to vector<128x128xf32>
    %48 = arith.addf %43, %47 : vector<128x128xf32>
    %49 = vector.extract_strided_slice %48 {offsets = [0, 0], sizes = [32, 128], strides = [1, 1]} : vector<128x128xf32> to vector<32x128xf32>
    %50 = arith.negf %49 : vector<32x128xf32>
    %51 = math.exp %50 : vector<32x128xf32>
    %cst_32 = arith.constant 1.000000e+00 : f32
    %52 = vector.broadcast %cst_32 : f32 to vector<32x128xf32>
    %53 = arith.addf %52, %51 : vector<32x128xf32>
    %54 = arith.divf %52, %53 : vector<32x128xf32>
    %55 = vector.extract_strided_slice %48 {offsets = [32, 0], sizes = [32, 128], strides = [1, 1]} : vector<128x128xf32> to vector<32x128xf32>
    %56 = arith.negf %55 : vector<32x128xf32>
    %57 = math.exp %56 : vector<32x128xf32>
    %cst_33 = arith.constant 1.000000e+00 : f32
    %58 = vector.broadcast %cst_33 : f32 to vector<32x128xf32>
    %59 = arith.addf %58, %57 : vector<32x128xf32>
    %60 = arith.divf %58, %59 : vector<32x128xf32>
    %61 = vector.extract_strided_slice %48 {offsets = [64, 0], sizes = [32, 128], strides = [1, 1]} : vector<128x128xf32> to vector<32x128xf32>
    %62 = math.tanh %61 : vector<32x128xf32>
    %63 = vector.extract_strided_slice %48 {offsets = [96, 0], sizes = [32, 128], strides = [1, 1]} : vector<128x128xf32> to vector<32x128xf32>
    %64 = arith.negf %63 : vector<32x128xf32>
    %65 = math.exp %64 : vector<32x128xf32>
    %cst_34 = arith.constant 1.000000e+00 : f32
    %66 = vector.broadcast %cst_34 : f32 to vector<32x128xf32>
    %67 = arith.addf %66, %65 : vector<32x128xf32>
    %68 = arith.divf %66, %67 : vector<32x128xf32>
    %69 = arith.mulf %60, %41 : vector<32x128xf32>
    %70 = arith.mulf %54, %62 : vector<32x128xf32>
    %71 = arith.addf %69, %70 : vector<32x128xf32>
    %72 = math.tanh %71 : vector<32x128xf32>
    %73 = arith.mulf %68, %72 : vector<32x128xf32>
    %c1_i32 = arith.constant 1 : i32
    %74 = arith.truncf %73 : vector<32x128xf32> to vector<32x128xbf16>
    %cst_35 = arith.constant dense<0.000000e+00> : vector<128x128xf32>
    %75 = tpu.matmul %39, %74, %cst_35 {dimension_numbers = #tpu.dot_dimension_numbers<[1], [0], [0], [1], [0, 0, 1, 1], [], []>} : vector<128x32xbf16>, vector<32x128xbf16>, vector<128x128xf32> -> vector<128x128xf32>
    %76 = arith.index_cast %c1_i32 : i32 to index
    %c0_36 = arith.constant 0 : index
    %c0_37 = arith.constant 0 : index
    %77 = vector.load %arg11[%76, %c0_36, %c0_37] : memref<3x128x128xbf16, #tpu.memory_space<vmem>>, vector<1x128x128xbf16>
    %78 = vector.shape_cast %77 : vector<1x128x128xbf16> to vector<128x128xbf16>
    %79 = arith.extf %78 : vector<128x128xbf16> to vector<128x128xf32>
    %80 = arith.addf %75, %79 : vector<128x128xf32>
    %81 = vector.extract_strided_slice %80 {offsets = [0, 0], sizes = [32, 128], strides = [1, 1]} : vector<128x128xf32> to vector<32x128xf32>
    %82 = arith.negf %81 : vector<32x128xf32>
    %83 = math.exp %82 : vector<32x128xf32>
    %cst_38 = arith.constant 1.000000e+00 : f32
    %84 = vector.broadcast %cst_38 : f32 to vector<32x128xf32>
    %85 = arith.addf %84, %83 : vector<32x128xf32>
    %86 = arith.divf %84, %85 : vector<32x128xf32>
    %87 = vector.extract_strided_slice %80 {offsets = [32, 0], sizes = [32, 128], strides = [1, 1]} : vector<128x128xf32> to vector<32x128xf32>
    %88 = arith.negf %87 : vector<32x128xf32>
    %89 = math.exp %88 : vector<32x128xf32>
    %cst_39 = arith.constant 1.000000e+00 : f32
    %90 = vector.broadcast %cst_39 : f32 to vector<32x128xf32>
    %91 = arith.addf %90, %89 : vector<32x128xf32>
    %92 = arith.divf %90, %91 : vector<32x128xf32>
    %93 = vector.extract_strided_slice %80 {offsets = [64, 0], sizes = [32, 128], strides = [1, 1]} : vector<128x128xf32> to vector<32x128xf32>
    %94 = math.tanh %93 : vector<32x128xf32>
    %95 = vector.extract_strided_slice %80 {offsets = [96, 0], sizes = [32, 128], strides = [1, 1]} : vector<128x128xf32> to vector<32x128xf32>
    %96 = arith.negf %95 : vector<32x128xf32>
    %97 = math.exp %96 : vector<32x128xf32>
    %cst_40 = arith.constant 1.000000e+00 : f32
    %98 = vector.broadcast %cst_40 : f32 to vector<32x128xf32>
    %99 = arith.addf %98, %97 : vector<32x128xf32>
    %100 = arith.divf %98, %99 : vector<32x128xf32>
    %101 = arith.mulf %92, %71 : vector<32x128xf32>
    %102 = arith.mulf %86, %94 : vector<32x128xf32>
    %103 = arith.addf %101, %102 : vector<32x128xf32>
    %104 = math.tanh %103 : vector<32x128xf32>
    %105 = arith.mulf %100, %104 : vector<32x128xf32>
    %c2_i32 = arith.constant 2 : i32
    %106 = arith.truncf %105 : vector<32x128xf32> to vector<32x128xbf16>
    %cst_41 = arith.constant dense<0.000000e+00> : vector<128x128xf32>
    %107 = tpu.matmul %39, %106, %cst_41 {dimension_numbers = #tpu.dot_dimension_numbers<[1], [0], [0], [1], [0, 0, 1, 1], [], []>} : vector<128x32xbf16>, vector<32x128xbf16>, vector<128x128xf32> -> vector<128x128xf32>
    %108 = arith.index_cast %c2_i32 : i32 to index
    %c0_42 = arith.constant 0 : index
    %c0_43 = arith.constant 0 : index
    %109 = vector.load %arg11[%108, %c0_42, %c0_43] : memref<3x128x128xbf16, #tpu.memory_space<vmem>>, vector<1x128x128xbf16>
    %110 = vector.shape_cast %109 : vector<1x128x128xbf16> to vector<128x128xbf16>
    %111 = arith.extf %110 : vector<128x128xbf16> to vector<128x128xf32>
    %112 = arith.addf %107, %111 : vector<128x128xf32>
    %113 = vector.extract_strided_slice %112 {offsets = [0, 0], sizes = [32, 128], strides = [1, 1]} : vector<128x128xf32> to vector<32x128xf32>
    %114 = arith.negf %113 : vector<32x128xf32>
    %115 = math.exp %114 : vector<32x128xf32>
    %cst_44 = arith.constant 1.000000e+00 : f32
    %116 = vector.broadcast %cst_44 : f32 to vector<32x128xf32>
    %117 = arith.addf %116, %115 : vector<32x128xf32>
    %118 = arith.divf %116, %117 : vector<32x128xf32>
    %119 = vector.extract_strided_slice %112 {offsets = [32, 0], sizes = [32, 128], strides = [1, 1]} : vector<128x128xf32> to vector<32x128xf32>
    %120 = arith.negf %119 : vector<32x128xf32>
    %121 = math.exp %120 : vector<32x128xf32>
    %cst_45 = arith.constant 1.000000e+00 : f32
    %122 = vector.broadcast %cst_45 : f32 to vector<32x128xf32>
    %123 = arith.addf %122, %121 : vector<32x128xf32>
    %124 = arith.divf %122, %123 : vector<32x128xf32>
    %125 = vector.extract_strided_slice %112 {offsets = [64, 0], sizes = [32, 128], strides = [1, 1]} : vector<128x128xf32> to vector<32x128xf32>
    %126 = math.tanh %125 : vector<32x128xf32>
    %127 = vector.extract_strided_slice %112 {offsets = [96, 0], sizes = [32, 128], strides = [1, 1]} : vector<128x128xf32> to vector<32x128xf32>
    %128 = arith.negf %127 : vector<32x128xf32>
    %129 = math.exp %128 : vector<32x128xf32>
    %cst_46 = arith.constant 1.000000e+00 : f32
    %130 = vector.broadcast %cst_46 : f32 to vector<32x128xf32>
    %131 = arith.addf %130, %129 : vector<32x128xf32>
    %132 = arith.divf %130, %131 : vector<32x128xf32>
    %133 = arith.mulf %124, %103 : vector<32x128xf32>
    %134 = arith.mulf %118, %126 : vector<32x128xf32>
    %135 = arith.addf %133, %134 : vector<32x128xf32>
    %136 = math.tanh %135 : vector<32x128xf32>
    %137 = arith.mulf %132, %136 : vector<32x128xf32>
    %c3_i32 = arith.constant 3 : i32
    %c0_47 = arith.constant 0 : index
    %c0_48 = arith.constant 0 : index
    %138 = vector.load %arg8[%c0_47, %c0_48] : memref<8x32xbf16, #tpu.memory_space<vmem>>, vector<8x32xbf16>
    %139 = arith.truncf %137 : vector<32x128xf32> to vector<32x128xbf16>
    %cst_49 = arith.constant dense<0.000000e+00> : vector<8x128xf32>
    %140 = tpu.matmul %138, %139, %cst_49 {dimension_numbers = #tpu.dot_dimension_numbers<[1], [0], [0], [1], [0, 0, 1, 1], [], []>} : vector<8x32xbf16>, vector<32x128xbf16>, vector<8x128xf32> -> vector<8x128xf32>
    %c0_50 = arith.constant 0 : index
    %c0_51 = arith.constant 0 : index
    %141 = vector.load %arg9[%c0_50, %c0_51] : memref<8x1xf32, #tpu.memory_space<vmem>>, vector<8x1xf32>
    %142 = vector.broadcast %141 : vector<8x1xf32> to vector<8x128xf32>
    %143 = arith.addf %140, %142 : vector<8x128xf32>
    %c0_52 = arith.constant 0 : index
    %c0_53 = arith.constant 0 : index
    %144 = vector.load %arg10[%c0_52, %c0_53] : memref<8x128xf32, #tpu.memory_space<vmem>>, vector<8x128xf32>
    tpu.vector_store %arg10[%c0_52, %c0_53], %143 {strides = array<i32>} : memref<8x128xf32, #tpu.memory_space<vmem>>, vector<8x128xf32>,
    return
  }
  func.func @transform_0(%arg0: i32) -> (i32, i32, i32) {
    %c0_i32 = arith.constant 0 : i32
    %c0_i32_0 = arith.constant 0 : i32
    %c0_i32_1 = arith.constant 0 : i32
    return %arg0, %c0_i32, %c0_i32_0 : i32, i32, i32
  }
  func.func @transform_1(%arg0: i32) -> (i32, i32, i32) {
    %c0_i32 = arith.constant 0 : i32
    %c0_i32_0 = arith.constant 0 : i32
    %c0_i32_1 = arith.constant 0 : i32
    return %arg0, %c0_i32, %c0_i32_0 : i32, i32, i32
  }
  func.func @transform_2(%arg0: i32) -> (i32, i32) {
    %c0_i32 = arith.constant 0 : i32
    %c0_i32_0 = arith.constant 0 : i32
    %c0_i32_1 = arith.constant 0 : i32
    return %c0_i32, %c0_i32_0 : i32, i32
  }
  func.func @transform_3(%arg0: i32) -> (i32, i32) {
    %c0_i32 = arith.constant 0 : i32
    %c0_i32_0 = arith.constant 0 : i32
    %c0_i32_1 = arith.constant 0 : i32
    return %c0_i32, %c0_i32_0 : i32, i32
  }
  func.func @transform_4(%arg0: i32) -> (i32, i32) {
    %c0_i32 = arith.constant 0 : i32
    %c0_i32_0 = arith.constant 0 : i32
    %c0_i32_1 = arith.constant 0 : i32
    return %c0_i32, %c0_i32_0 : i32, i32
  }
  func.func @transform_5(%arg0: i32) -> (i32, i32) {
    %c0_i32 = arith.constant 0 : i32
    %c0_i32_0 = arith.constant 0 : i32
    %c0_i32_1 = arith.constant 0 : i32
    return %c0_i32, %c0_i32_0 : i32, i32
  }
  func.func @transform_6(%arg0: i32) -> (i32, i32) {
    %c0_i32 = arith.constant 0 : i32
    %c0_i32_0 = arith.constant 0 : i32
    %c0_i32_1 = arith.constant 0 : i32
    return %c0_i32, %c0_i32_0 : i32, i32
  }
  func.func @transform_7(%arg0: i32) -> (i32, i32) {
    %c0_i32 = arith.constant 0 : i32
    %c0_i32_0 = arith.constant 0 : i32
    %c0_i32_1 = arith.constant 0 : i32
    return %c0_i32, %c0_i32_0 : i32, i32
  }
  func.func @transform_8(%arg0: i32) -> (i32, i32) {
    %c0_i32 = arith.constant 0 : i32
    %c0_i32_0 = arith.constant 0 : i32
    %c0_i32_1 = arith.constant 0 : i32
    return %c0_i32, %c0_i32_0 : i32, i32
  }
  func.func @transform_9(%arg0: i32) -> (i32, i32) {
    %c0_i32 = arith.constant 0 : i32
    %c0_i32_0 = arith.constant 0 : i32
    return %c0_i32, %arg0 : i32, i32
  }
}

</mosaic_0001>

<bundles_post_ra>
// kernel: cnn_lstm_forward.1
= control target key start
LH: loop header
LB: loop body
LE: loop exit
PB: predicated region body
PF: predicated region fallthrough
CT: control target
= control target key end

     0   :  { %v2380_v2 = vmov 0   ;;  %vm56_vm0 = vcmask 1042432   ;;  %vm52_vm1 = vcmask 48128   ;;  %vm385_vm2 = vcmask 1043456   ;;  %s3480_s0 = inlined_call_operand.vmem [shape: bf16[1,6,512], index: 0, kind: input, shape index: {}]   ;;  %s3481_s3 = inlined_call_operand.vmem [shape: f32[8,1], index: 3, kind: input, shape index: {}]   ;;  %s3482_s1 = inlined_call_operand.vmem [shape: bf16[1,6,384], index: 1, kind: input, shape index: {}]   ;;  %s3483_s2 = inlined_call_operand.vmem [shape: bf16[16,6], index: 2, kind: input, shape index: {}]   ;;  %s3484_s6 = inlined_call_operand.vmem [shape: f32[128,1], index: 6, kind: input, shape index: {}]   ;;  %s3485_s4 = inlined_call_operand.vmem [shape: bf16[128,8], index: 4, kind: input, shape index: {}]   ;;  %s3486_s5 = inlined_call_operand.vmem [shape: bf16[128,32], index: 5, kind: input, shape index: {}]   ;;  %s3487_s8 = inlined_call_operand.vmem [shape: f32[8,1], index: 8, kind: input, shape index: {}]   ;;  %s3488_s7 = inlined_call_operand.vmem [shape: bf16[8,32], index: 7, kind: input, shape index: {}]   ;;  %s3489_s9 = inlined_call_operand.vmem [shape: f32[8,128], index: 9, kind: output, shape index: {}]  }
   0x1   :  { %v35_v0 = vld [vmem:[%s3480_s0] sm:$0x77]  ;;  %v36_v1 = vld [vmem:[%s3480_s0 + $0x8] sm:$0x77]  ;;  %2177 = vset.pattern.permute.xlu0 %v2380_v2  ;;  %2178 = vset.pattern.permute.xlu1 %v2380_v2  ;;  %v226_v27 = vld [vmem:[%s3484_s6 + $0x10] sm:$0xff]  ;;  %vm360_vm3 = vcmask 64512  }
   0x2   :  { %v193_v3 = vld [vmem:[%s3481_s3] sm:$0xff]  ;;  %v44_v4 = vunpack.c.l.b16 %v35_v0  ;;  %v45_v5 = vunpack.c.h.b16 %v35_v0  ;;  %v46_v6 = vunpack.c.l.b16 %v36_v1  ;;  %v47_v7 = vunpack.c.h.b16 %v36_v1  ;;  %2179 = vset.pattern.permute.xlu2 %v2380_v2  ;;  %v124_v11 = vld [vmem:[%s3482_s1 + $0x8] sm:$0x7]  ;;  %v238_v30 = vld [vmem:[%s3484_s6 + $0x70] sm:$0xff] }
   0x3   :  { %196 = vperm.xlu0 %2177, %v193_v3   ;;  %v123_v8 = vld [vmem:[%s3482_s1] sm:$0x77]  ;;  %v129_v18 = vunpack.c.l.b16 %v124_v11  ;;  %v225_v29 = vld [vmem:[%s3484_s6 + $0x8] sm:$0xff]  ;;  %v227_v33 = vld [vmem:[%s3484_s6 + $0x18] sm:$0xff]  ;;  %vm760_vm4 = vcmask 261120  }
   0x4   :  { %v127_v9 = vunpack.c.l.b16 %v123_v8  ;;  %v128_v10 = vunpack.c.h.b16 %v123_v8  ;;  %v48_v12 = vpack.c.b16 %v44_v4, %v44_v4  ;;  %v49_v13 = vpack.c.b16 %v45_v5, %v45_v5  ;;  %v1946_v22 = vld [vmem:[%s3483_s2] sm:$0xff]  ;;  %v237_v31 = vld [vmem:[%s3484_s6 + $0x68] sm:$0xff]  ;;  %257 = vperm.xlu1 %2178, %v227_v33   ;;  %v230_v36 = vld [vmem:[%s3484_s6 + $0x30] sm:$0xff] }
   0x5   :  { %v50_v14 = vpack.c.b16 %v46_v6, %v46_v6  ;;  %v51_v15 = vpack.c.b16 %v47_v7, %v47_v7  ;;  %v132_v26 = vpack.c.b16 %v129_v18, %v129_v18  ;;  %v232_v32 = vld [vmem:[%s3484_s6 + $0x40] sm:$0xff]  ;;  %v239_v42 = vld [vmem:[%s3484_s6 + $0x78] sm:$0xff]  ;;  %v234_v49 = vld [vmem:[%s3484_s6 + $0x50] sm:$0xff] }
   0x6   :  { %v130_v16 = vpack.c.b16 %v127_v9, %v127_v9  ;;  %v131_v17 = vpack.c.b16 %v128_v10, %v128_v10  ;;  %v58_v19 = vsel %vm56_vm0, %v48_v12, 0  ;;  %v61_v20 = vsel %vm56_vm0, %v49_v13, 0  ;;  %v228_v40 = vld [vmem:[%s3484_s6 + $0x20] sm:$0xff]  ;;  %v233_v61 = vld [vmem:[%s3484_s6 + $0x48] sm:$0xff]  ;;  %v1950_v9 = vld [vmem:[%s3485_s4 + $0x18] sm:$0xff] }
   0x7   :  { %v64_v21 = vsel %vm56_vm0, %v50_v14, 0  ;;  %v67_v23 = vsel %vm56_vm0, %v51_v15, 0  ;;  %76 = vmatpush.bf16.msra.mxu0 %v58_v19  ;;  %89 = vmatpush.bf16.msra.mxu1 %v61_v20  ;;  %v140_v28 = vsel %vm56_vm0, %v132_v26, 0  ;;  %v1947_v8 = vld [vmem:[%s3485_s4] sm:$0xff]  ;;  %v231_v14 = vld [vmem:[%s3484_s6 + $0x38] sm:$0xff]  ;;  %v229_v18 = vld [vmem:[%s3484_s6 + $0x28] sm:$0xff] }
   0x8   :  { %v134_v24 = vsel %vm56_vm0, %v130_v16, 0  ;;  %v137_v25 = vsel %vm56_vm0, %v131_v17, 0  ;;  %103 = vmatpush.bf16.msra.mxu2 %v64_v21  ;;  %117 = vmatpush.bf16.msra.mxu3 %v67_v23  ;;  %v1951_v11 = vld [vmem:[%s3485_s4 + $0x20] sm:$0xff]  ;;  %v1948_v16 = vld [vmem:[%s3485_s4 + $0x8] sm:$0xff]  ;;  %v1949_v20 = vld [vmem:[%s3485_s4 + $0x10] sm:$0xff] }
   0x9   :  { %277 = vperm.xlu2 %2179, %v231_v14   ;;  %v1952_v17 = vld [vmem:[%s3485_s4 + $0x28] sm:$0xff]  ;;  %v236_v19 = vld [vmem:[%s3484_s6 + $0x60] sm:$0xff]  ;;  %v2544_v21 = vld [vmem:[%s3485_s4 + $0x30] sm:$0xff] }
   0xa   :  { %1790 = vmatmul.msk.bf16.vlgmr.msra.gmra.mxu0 %vm52_vm1, %v1946_v22  ;;  %1791 = vmatmul.msk.bf16.vlgmr.msra.gmra.mxu1 %vm52_vm1, %v1946_v22  ;;  %v2557_v23 = vld [vmem:[%s3485_s4 + $0x38] sm:$0xff]  ;;  %v1957_v26 = vld [vmem:[%s3486_s5 + $0x10] sm:$0xff] }
   0xb   :  { %149 = vmatpush.bf16.msrb.mxu0 %v134_v24  ;;  %163 = vmatpush.bf16.msrb.mxu1 %v137_v25  ;;  %v1955_v24 = vld [vmem:[%s3486_s5] sm:$0xff]  ;;  %v1956_v25 = vld [vmem:[%s3486_s5 + $0x8] sm:$0xff] }
   0xc   :  { %1792 = vmatmul.msk.bf16.vlgmr.msra.gmra.mxu2 %vm52_vm1, %v1946_v22  ;;  %252 = vperm.xlu0 %2177, %v226_v27  }
   0xd   :  { %177 = vmatpush.bf16.msrb.mxu2 %v140_v28  ;;  %1793 = vmatmul.msk.bf16.vlgmr.msra.gmra.mxu3 %vm52_vm1, %v1946_v22 }
   0xe   :  { %272 = vperm.xlu1 %2178, %v230_v36  }
  0x14   :  { %247 = vperm.xlu0 %2177, %v225_v29   ;;  %v1958_v29 = vld [vmem:[%s3486_s5 + $0x18] sm:$0xff] }
  0x16   :  { %262 = vperm.xlu1 %2178, %v228_v40  }
  0x1a   :  { %1794 = vmatmul.msk.bf16.vlgmr.msrb.gmra.mxu0 %vm52_vm1, %v1946_v22  ;;  %1795 = vmatmul.msk.bf16.vlgmr.msrb.gmra.mxu1 %vm52_vm1, %v1946_v22 }
  0x1c   :  { %1796 = vmatmul.msk.bf16.vlgmr.msrb.gmra.mxu2 %vm52_vm1, %v1946_v22  ;;  %312 = vperm.xlu0 %2177, %v238_v30   ;;  %v235_v22 = vld [vmem:[%s3484_s6 + $0x58] sm:$0xff] }
  0x1e   :  { %317 = vperm.xlu1 %2178, %v239_v42  }
  0x24   :  { %307 = vperm.xlu0 %2177, %v237_v31  }
  0x26   :  { %292 = vperm.xlu1 %2178, %v234_v49  }
  0x2c   :  { %282 = vperm.xlu0 %2177, %v232_v32  }
  0x2e   :  { %287 = vperm.xlu1 %2178, %v233_v61  }
  0x63   :  { %v2593_v31 = vpop.permute.xlu2 %277 }
  0x75   :  { %v197_v57 = vpop.permute.xlu0 %196 }
  0x76   :  { %v2582_v27 = vpop.permute.xlu1 %257 }
  0x7e   :  { %v2584_v28 = vpop.permute.xlu0 %252 }
  0x80   :  { %v2590_v30 = vpop.permute.xlu1 %272 }
  0x86   :  { %v2595_v32 = vpop.permute.xlu0 %247 }
  0x87   :  { %v78_v34 = vpop.f32.mrf.mxu0  ;;  %v91_v35 = vpop.f32.mrf.mxu1 }
  0x88   :  { %v2597_v33 = vpop.permute.xlu1 %262 }
  0x8f   :  { %v105_v37 = vpop.f32.mrf.mxu2  ;;  %v80_v38 = vpop.f32.mrf.mxu0 }
  0x90   :  { %v93_v39 = vpop.f32.mrf.mxu1  ;;  %v119_v41 = vpop.f32.mrf.mxu3 }
  0x97   :  { %v107_v43 = vpop.f32.mrf.mxu2  ;;  %v151_v44 = vpop.f32.mrf.mxu0 }
  0x98   :  { %v165_v45 = vpop.f32.mrf.mxu1  ;;  %v187_v50 = vadd.f32 %v151_v44, %v93_v39  ;;  %v120_v56 = vpop.f32.mrf.mxu3 }
  0x99   :  { %v188_v51 = vadd.f32 %v165_v45, %v107_v43  ;;  %v2605_v39 = vpop.permute.xlu0 %312  ;;  %v2610_v45 = vpop.permute.xlu1 %317 }
  0x9f   :  { %v179_v46 = vpop.f32.mrf.mxu2  ;;  %v153_v47 = vpop.f32.mrf.mxu0 }
  0xa0   :  { %v167_v48 = vpop.f32.mrf.mxu1  ;;  %v184_v52 = vadd.f32 %v153_v47, %v78_v34  ;;  %v189_v60 = vadd.f32 %v179_v46, %v120_v56 }
  0xa1   :  { %v185_v53 = vadd.f32 %v167_v48, %v91_v35  ;;  %v1959_v35 = vld [vmem:[%s3486_s5 + $0x20] sm:$0xff] }
  0xa2   :  { %v190_v54 = vmax.f32 %v184_v52, %v187_v50 }
  0xa3   :  { %v191_v55 = vmax.f32 %v185_v53, %v188_v51  ;;  %v2616_v51 = vpop.permute.xlu0 %307 }
  0xa4   :  { %v199_v58 = vadd.f32 %v197_v57, %v190_v54 }
  0xa5   :  { %v200_v59 = vadd.f32 %v197_v57, %v191_v55 }
  0xa6   :  { %v202_v63 = vmax.f32 %v199_v58, 0.0 }
  0xa7   :  { %v181_v62 = vpop.f32.mrf.mxu2  ;;  %v203_v0 = vmax.f32 %v200_v59, 0.0  ;;  %v2627_v59 = vld [vmem:[%s3486_s5 + $0x28] sm:$0xff] }
  0xa8   :  { %v186_v1 = vadd.f32 %v181_v62, %v105_v37  ;;  %v205_v3 = vpack.c.bf16 %v202_v63, %v202_v63  ;;  %v2634_v63 = vpop.permute.xlu1 %292 }
  0xa9   :  { %v206_v4 = vpack.c.bf16 %v203_v0, %v203_v0 }
  0xaa   :  { %v192_v5 = vmax.f32 %v186_v1, %v189_v60  ;;  %v387_v6 = vsel %vm385_vm2, %v205_v3, 0 }
  0xab   :  { %v390_v7 = vsel %vm385_vm2, %v206_v4, 0  ;;  %402 = vmatpush.bf16.msra.mxu1 %v387_v6  ;;  %2174 = vmatpush.bf16.msrb.mxu3 %v387_v6  ;;  %v2641_v3 = vpop.permute.xlu0 %282 }
  0xac   :  { %v201_v10 = vadd.f32 %v197_v57, %v192_v5  ;;  %451 = vmatpush.bf16.msra.mxu0 %v390_v7  ;;  %2175 = vmatpush.bf16.msra.mxu2 %v390_v7 }
  0xae   :  { %v204_v12 = vmax.f32 %v201_v10, 0.0  ;;  %1829 = vmatmul.msk.bf16.vlgmr.msra.gmra.mxu1 %vm360_vm3, %v1947_v8  ;;  %1832 = vmatmul.msk.bf16.vlgmr.msrb.gmra.mxu3 %vm360_vm3, %v1950_v9 }
  0xaf   :  { %1837 = vmatmul.msk.bf16.vlgmr.msra.gmra.mxu0 %vm360_vm3, %v1947_v8  ;;  %1841 = vmatmul.msk.bf16.vlgmr.msra.gmra.mxu2 %vm360_vm3, %v1951_v11 }
  0xb0   :  { %792 = vmatpush.bf16.msrb.mxu2 %v2380_v2  ;;  %v207_v13 = vpack.c.bf16 %v204_v12, %v204_v12  ;;  %v224_v2 = vld [vmem:[%s3484_s6] sm:$0xff] }
  0xb1   :  { %242 = vperm.xlu2 %2179, %v224_v2  }
  0xb2   :  { %v393_v15 = vsel %vm385_vm2, %v207_v13, 0 }
  0xb3   :  { %500 = vmatpush.bf16.msrb.mxu1 %v393_v15 }
  0xb9   :  { %267 = vperm.xlu2 %2179, %v229_v18  }
  0xbe   :  { %1830 = vmatmul.msk.bf16.gmra.mxu1 %vm360_vm3, %v1948_v16  ;;  %1833 = vmatmul.msk.bf16.gmra.mxu3 %vm360_vm3, %v1951_v11 }
  0xbf   :  { %1838 = vmatmul.msk.bf16.gmra.mxu0 %vm360_vm3, %v1948_v16  ;;  %1842 = vmatmul.msk.bf16.gmra.mxu2 %vm360_vm3, %v1952_v17 }
  0xc1   :  { %302 = vperm.xlu2 %2179, %v236_v19  }
  0xc9   :  { %297 = vperm.xlu2 %2179, %v235_v22  }
  0xce   :  { %1831 = vmatmul.msk.bf16.gmra.mxu1 %vm360_vm3, %v1949_v20  ;;  %1834 = vmatmul.msk.bf16.gmra.mxu3 %vm360_vm3, %v1952_v17 }
  0xcf   :  { %1843 = vmatmul.msk.bf16.gmra.mxu2 %vm360_vm3, %v2544_v21  ;;  %1839 = vmatmul.msk.bf16.gmra.mxu0 %vm360_vm3, %v1949_v20 }
  0xde   :  { %1835 = vmatmul.msk.bf16.gmra.mxu3 %vm360_vm3, %v2544_v21  ;;  %1845 = vmatmul.msk.bf16.vlgmr.msrb.gmra.mxu1 %vm360_vm3, %v1947_v8 }
  0xdf   :  { %1844 = vmatmul.msk.bf16.gmra.mxu2 %vm360_vm3, %v2557_v23  ;;  %1840 = vmatmul.msk.bf16.gmra.mxu0 %vm360_vm3, %v1950_v9 }
  0xee   :  { %1836 = vmatmul.msk.bf16.gmra.mxu3 %vm360_vm3, %v2557_v23  ;;  %1846 = vmatmul.msk.bf16.gmra.mxu1 %vm360_vm3, %v1948_v16  ;;  %v2651_v16 = vpop.permute.xlu1 %287 }
  0xef   :  { %1885 = vmatmul.msk.bf16.vlgmr.msrb.gmra.mxu2 %vm760_vm4, %v1955_v24 }
  0xfe   :  { %1847 = vmatmul.msk.bf16.gmra.mxu1 %vm360_vm3, %v1949_v20 }
  0xff   :  { %1886 = vmatmul.msk.bf16.gmra.mxu2 %vm760_vm4, %v1956_v25  ;;  %v2658_v25 = vld [vmem:[%s3486_s5 + $0x30] sm:$0xff] }
 0x10b   :  { %v2602_v36 = vpop.permute.xlu2 %242 }
 0x10e   :  { %1848 = vmatmul.msk.bf16.gmra.mxu1 %vm360_vm3, %v1950_v9 }
 0x10f   :  { %1887 = vmatmul.msk.bf16.gmra.mxu2 %vm760_vm4, %v1957_v26 }
 0x113   :  { %v2645_v9 = vpop.permute.xlu2 %267 }
 0x11e   :  { %1849 = vmatmul.msk.bf16.gmra.mxu1 %vm360_vm3, %v1951_v11 }
 0x11f   :  { %1888 = vmatmul.msk.bf16.gmra.mxu2 %vm760_vm4, %v1958_v29 }
 0x12b   :  { %v404_v34 = vpop.f32.mrf.mxu1 }
 0x12c   :  { %v453_v37 = vpop.f32.mrf.mxu0  ;;  %v405_v38 = vadd.f32 %v404_v34, %v2602_v36  ;;  %v2662_v34 = vpop.permute.xlu2 %302 }
 0x12d   :  { %v454_v40 = vadd.f32 %v453_v37, %v2602_v36  ;;  %v1759_v37 = vld [vmem:[%s3487_s8] sm:$0xff] }
 0x12e   :  { %1850 = vmatmul.msk.bf16.gmra.mxu1 %vm360_vm3, %v1952_v17  ;;  %1762 = vperm.xlu2 %2179, %v1759_v37  }
 0x12f   :  { %1889 = vmatmul.msk.bf16.gmra.mxu2 %vm760_vm4, %v1959_v35  ;;  %v542_v41 = vpack.c.bf16 %v454_v40, %v405_v38 }
 0x131   :  { %v606_v42 = vrot.slane %v542_v41, 4  ;;  %v419_v43 = vpop.f32.mrf.mxu3 }
 0x132   :  { %v473_v44 = vpop.f32.mrf.mxu2  ;;  %v2619_v53 = vadd.f32 %v419_v43, %v2590_v30 }
 0x133   :  { %639 = vst [vmem:[#allocation2 + $0x40] sm:$0xf] %v606_v42  ;;  %v406_v46 = vpop.f32.mrf.mxu1  ;;  %v474_v6 = vadd.f32 %v473_v44, %v2641_v3 }
 0x134   :  { %v407_v47 = vadd.f32 %v406_v46, %v2595_v32  ;;  %v455_v48 = vpop.f32.mrf.mxu0 }
 0x135   :  { %v456_v49 = vadd.f32 %v455_v48, %v2595_v32  ;;  %v2677_v48 = vpop.permute.xlu2 %297 }
 0x136   :  { %v2614_v50 = vpack.c.bf16 %v407_v47, %v405_v38 }
 0x137   :  { %v544_v52 = vpack.c.bf16 %v456_v49, %v407_v47 }
 0x139   :  { %v607_v54 = vrot.slane %v544_v52, 4  ;;  %v421_v55 = vpop.f32.mrf.mxu3 }
 0x13a   :  { %v2622_v56 = vadd.f32 %v421_v55, %v2593_v31  ;;  %v475_v57 = vpop.f32.mrf.mxu2 }
 0x13b   :  { %640 = vst [vmem:[#allocation2 + $0x44] sm:$0xf] %v607_v54  ;;  %v409_v58 = vpop.f32.mrf.mxu1  ;;  %v476_v20 = vadd.f32 %v475_v57, %v2651_v16 }
 0x13c   :  { %v2631_v60 = vpack.c.bf16 %v2622_v56, %v2619_v53  ;;  %v410_v61 = vadd.f32 %v409_v58, %v2584_v28  ;;  %v458_v62 = vpop.f32.mrf.mxu0 }
 0x13d   :  { %v459_v0 = vadd.f32 %v458_v62, %v2584_v28 }
 0x13e   :  { %1851 = vmatmul.msk.bf16.gmra.mxu1 %vm360_vm3, %v2544_v21 }
 0x13f   :  { %v546_v1 = vpack.c.bf16 %v459_v0, %v410_v61  ;;  %1890 = vmatmul.msk.bf16.gmra.mxu2 %vm760_vm4, %v2627_v59 }
 0x141   :  { %v608_v4 = vrot.slane %v546_v1, 4  ;;  %v424_v5 = vpop.f32.mrf.mxu3 }
 0x142   :  { %v425_v7 = vadd.f32 %v424_v5, %v2641_v3  ;;  %v478_v8 = vpop.f32.mrf.mxu2 }
 0x143   :  { %641 = vst [vmem:[#allocation2 + $0x48] sm:$0xf] %v608_v4  ;;  %v411_v10 = vpop.f32.mrf.mxu1  ;;  %v479_v40 = vadd.f32 %v478_v8, %v2634_v63 }
 0x144   :  { %v558_v11 = vpack.c.bf16 %v474_v6, %v425_v7  ;;  %v412_v12 = vadd.f32 %v411_v10, %v2582_v27  ;;  %v460_v13 = vpop.f32.mrf.mxu0 }
 0x145   :  { %v461_v14 = vadd.f32 %v460_v13, %v2582_v27 }
 0x146   :  { %v614_v15 = vrot.slane %v558_v11, 4  ;;  %v2649_v2 = vpack.c.bf16 %v412_v12, %v410_v61  ;;  %v2687_v61 = vld [vmem:[%s3486_s5 + $0x38] sm:$0xff] }
 0x147   :  { %v548_v17 = vpack.c.bf16 %v461_v14, %v412_v12 }
 0x148   :  { %647 = vst [vmem:[#allocation2 + $0x60] sm:$0xf] %v614_v15 }
 0x149   :  { %v609_v18 = vrot.slane %v548_v17, 4  ;;  %v426_v19 = vpop.f32.mrf.mxu3 }
 0x14a   :  { %v427_v21 = vadd.f32 %v426_v19, %v2651_v16  ;;  %v480_v22 = vpop.f32.mrf.mxu2 }
 0x14b   :  { %642 = vst [vmem:[#allocation2 + $0x4c] sm:$0xf] %v609_v18  ;;  %v414_v24 = vpop.f32.mrf.mxu1  ;;  %v481_v54 = vadd.f32 %v480_v22, %v2677_v48 }
 0x14c   :  { %v560_v26 = vpack.c.bf16 %v476_v20, %v427_v21  ;;  %v2660_v29 = vpack.c.bf16 %v427_v21, %v425_v7  ;;  %v415_v43 = vadd.f32 %v414_v24, %v2597_v33  ;;  %v463_v13 = vpop.f32.mrf.mxu0 }
 0x14d   :  { %v464_v37 = vadd.f32 %v463_v13, %v2597_v33 }
 0x14e   :  { %v615_v35 = vrot.slane %v560_v26, 4  ;;  %1852 = vmatmul.msk.bf16.gmra.mxu1 %vm360_vm3, %v2557_v23 }
 0x14f   :  { %1891 = vmatmul.msk.bf16.gmra.mxu2 %vm760_vm4, %v2658_v25 }
 0x150   :  { %648 = vst [vmem:[#allocation2 + $0x64] sm:$0xf] %v615_v35 }
 0x151   :  { %v429_v38 = vpop.f32.mrf.mxu3 }
 0x152   :  { %v430_v41 = vadd.f32 %v429_v38, %v2634_v63  ;;  %v483_v42 = vpop.f32.mrf.mxu2 }
 0x153   :  { %v416_v44 = vpop.f32.mrf.mxu1  ;;  %v484_v5 = vadd.f32 %v483_v42, %v2662_v34 }
 0x154   :  { %v562_v46 = vpack.c.bf16 %v479_v40, %v430_v41  ;;  %v2675_v23 = vadd.f32 %v416_v44, %v2645_v9  ;;  %v465_v24 = vpop.f32.mrf.mxu0 }
 0x156   :  { %v616_v47 = vrot.slane %v562_v46, 4  ;;  %v2680_v49 = vpack.c.bf16 %v2675_v23, %v415_v43  ;;  %v550_v46 = vpack.c.bf16 %v464_v37, %v415_v43 }
 0x158   :  { %649 = vst [vmem:[#allocation2 + $0x68] sm:$0xf] %v616_v47 }
 0x159   :  { %v431_v52 = vpop.f32.mrf.mxu3 }
 0x15a   :  { %v432_v55 = vadd.f32 %v431_v52, %v2677_v48  ;;  %v485_v57 = vpop.f32.mrf.mxu2 }
 0x15b   :  { %v502_v58 = vpop.f32.mrf.mxu1  ;;  %v486_v18 = vadd.f32 %v485_v57, %v2616_v51  ;;  %v610_v57 = vrot.slane %v550_v46, 4 }
 0x15c   :  { %v564_v62 = vpack.c.bf16 %v481_v54, %v432_v55  ;;  %v2689_v0 = vpack.c.bf16 %v432_v55, %v430_v41  ;;  %v503_v6 = vadd.f32 %v502_v58, %v2602_v36  ;;  %v468_v55 = vpop.f32.mrf.mxu0 }
 0x15d   :  { %643 = vst [vmem:[#allocation2 + $0x50] sm:$0xf] %v610_v57 }
 0x15e   :  { %v617_v1 = vrot.slane %v564_v62, 4 }
 0x15f   :  { %1892 = vmatmul.msk.bf16.gmra.mxu2 %vm760_vm4, %v2687_v61 }
 0x160   :  { %650 = vst [vmem:[#allocation2 + $0x6c] sm:$0xf] %v617_v1 }
 0x161   :  { %v434_v4 = vpop.f32.mrf.mxu3 }
 0x162   :  { %v435_v7 = vadd.f32 %v434_v4, %v2662_v34  ;;  %v488_v8 = vpop.f32.mrf.mxu2  ;;  %v2046_v4 = vunpack.c.h.bf16 %v2614_v50 }
 0x163   :  { %v504_v10 = vpop.f32.mrf.mxu1  ;;  %v489_v38 = vadd.f32 %v488_v8, %v2605_v39 }
 0x164   :  { %v566_v11 = vpack.c.bf16 %v484_v5, %v435_v7  ;;  %v505_v12 = vadd.f32 %v504_v10, %v2595_v32  ;;  %v2045_v32 = vunpack.c.l.bf16 %v2614_v50  ;;  %v466_v5 = vadd.f32 %v465_v24, %v2645_v9 }
 0x166   :  { %v618_v14 = vrot.slane %v566_v11, 4  ;;  %v2006_v15 = vpack.c.bf16 %v505_v12, %v503_v6  ;;  %v470_v12 = vpop.f32.mrf.mxu0 }
 0x167   :  { %v471_v50 = vadd.f32 %v470_v12, %v2593_v31 }
 0x168   :  { %651 = vst [vmem:[#allocation2 + $0x70] sm:$0xf] %v618_v14  ;;  %v469_v14 = vadd.f32 %v468_v55, %v2590_v30 }
 0x169   :  { %2007 = vst [vmem:[#allocation2 + $0x80] sm:$0xff] %v2006_v15   ;;  %v436_v17 = vpop.f32.mrf.mxu3 }
 0x16a   :  { %v437_v19 = vadd.f32 %v436_v17, %v2616_v51  ;;  %v490_v20 = vpop.f32.mrf.mxu2  ;;  %v554_v17 = vpack.c.bf16 %v469_v14, %v2619_v53  ;;  %v2050_v53 = vunpack.c.h.bf16 %v2649_v2 }
 0x16b   :  { %v507_v21 = vpop.f32.mrf.mxu1  ;;  %v491_v6 = vadd.f32 %v490_v20, %v2610_v45 }
 0x16c   :  { %v568_v36 = vpack.c.bf16 %v486_v18, %v437_v19  ;;  %v2699_v22 = vpack.c.bf16 %v437_v19, %v435_v7  ;;  %v508_v47 = vadd.f32 %v507_v21, %v2584_v28  ;;  %v556_v18 = vpack.c.bf16 %v471_v50, %v2622_v56 }
 0x16d   :  { %v2049_v19 = vunpack.c.l.bf16 %v2649_v2  ;;  %v612_v20 = vrot.slane %v554_v17, 4  ;;  %v2054_v2 = vunpack.c.h.bf16 %v2680_v49 }
 0x16e   :  { %v619_v26 = vrot.slane %v568_v36, 4 }
 0x16f   :  { %645 = vst [vmem:[#allocation2 + $0x58] sm:$0xf] %v612_v20 }
 0x170   :  { %652 = vst [vmem:[#allocation2 + $0x74] sm:$0xf] %v619_v26 }
 0x171   :  { %v439_v35 = vpop.f32.mrf.mxu3 }
 0x172   :  { %v440_v40 = vadd.f32 %v439_v35, %v2605_v39  ;;  %v794_v41 = vpop.f32.mrf.mxu2 }
 0x173   :  { %v795_v42 = vadd.f32 %v2045_v32, %v794_v41  ;;  %v509_v44 = vpop.f32.mrf.mxu1  ;;  %v2053_v41 = vunpack.c.l.bf16 %v2680_v49 }
 0x174   :  { %v570_v52 = vpack.c.bf16 %v489_v38, %v440_v40  ;;  %v510_v54 = vadd.f32 %v509_v44, %v2582_v27  ;;  %v552_v27 = vpack.c.bf16 %v466_v5, %v2675_v23  ;;  %v613_v23 = vrot.slane %v556_v18, 4 }
 0x176   :  { %v620_v58 = vrot.slane %v570_v52, 4  ;;  %v2011_v62 = vpack.c.bf16 %v510_v54, %v508_v47  ;;  %v611_v13 = vrot.slane %v552_v27, 4  ;;  %646 = vst [vmem:[#allocation2 + $0x5c] sm:$0xf] %v613_v23 }
 0x178   :  { %653 = vst [vmem:[#allocation2 + $0x78] sm:$0xf] %v620_v58 }
 0x179   :  { %2146 = vst [vmem:[#allocation2 + $0x88] sm:$0xff] %v2011_v62   ;;  %v441_v1 = vpop.f32.mrf.mxu3 }
 0x17a   :  { %v442_v43 = vadd.f32 %v441_v1, %v2610_v45  ;;  %v796_v28 = vpop.f32.mrf.mxu2  ;;  %644 = vst [vmem:[#allocation2 + $0x54] sm:$0xf] %v611_v13 }
 0x17b   :  { %v797_v7 = vadd.f32 %v2046_v4, %v796_v28  ;;  %v512_v8 = vpop.f32.mrf.mxu1 }
 0x17c   :  { %v572_v10 = vpack.c.bf16 %v491_v6, %v442_v43  ;;  %v2712_v11 = vpack.c.bf16 %v442_v43, %v440_v40  ;;  %v513_v21 = vadd.f32 %v512_v8, %v2597_v33  ;;  %v1893_v40 = vmul.f32 -1.442695, %v795_v42 }
 0x17d   :  { %v1894_v52 = vmul.f32 -1.442695, %v797_v7 }
 0x17e   :  { %v621_v15 = vrot.slane %v572_v10, 4  ;;  %2180 = vpow2.f32 %v1893_v40 }
 0x180   :  { %654 = vst [vmem:[#allocation2 + $0x7c] sm:$0xf] %v621_v15 }
 0x182   :  { %v799_v36 = vpop.f32.mrf.mxu2 }
 0x183   :  { %v2720_v24 = vadd.f32 %v2049_v19, %v799_v36  ;;  %v514_v26 = vpop.f32.mrf.mxu1 }
 0x184   :  { %v515_v35 = vadd.f32 %v514_v26, %v2645_v9  ;;  %v2181_v57 = vpop.eup %2180  ;;  %v2061_v26 = vunpack.c.l.bf16 %v2660_v29 }
 0x185   :  { %v2730_v42 = vadd.f32 1.0, %v2181_v57 }
 0x186   :  { %v2016_v32 = vpack.c.bf16 %v515_v35, %v513_v21 }
 0x187   :  { %vm855_vm8 = vweird.f32 %v2730_v42 }
 0x188   :  { %2147 = vst [vmem:[#allocation2 + $0x90] sm:$0xff] %v2016_v32  }
 0x18a   :  { %v801_v56 = vpop.f32.mrf.mxu2 }
 0x18b   :  { %v2724_v37 = vadd.f32 %v2050_v53, %v801_v56  ;;  %v517_v38 = vpop.f32.mrf.mxu1 }
 0x18c   :  { %v518_v33 = vadd.f32 %v517_v38, %v2590_v30 }
 0x192   :  { %v804_v44 = vpop.f32.mrf.mxu2 }
 0x193   :  { %v805_v46 = vadd.f32 %v2053_v41, %v804_v44  ;;  %v519_v47 = vpop.f32.mrf.mxu1 }
 0x194   :  { %v520_v9 = vadd.f32 %v519_v47, %v2593_v31 }
 0x195   :  { %v1897_v54 = vmul.f32 -1.442695, %v805_v46 }
 0x196   :  { %v2021_v55 = vpack.c.bf16 %v520_v9, %v518_v33  ;;  %v861_v9 = vand.u32 2147483648, %v2730_v42 }
 0x197   :  { %2182 = vpow2.f32 %v1897_v54 }
 0x198   :  { %2148 = vst [vmem:[#allocation2 + $0x98] sm:$0xff] %v2021_v55   ;;  %2184 = vpow2.f32 %v1894_v52  ;;  %v859_v52 = vand.u32 2147483647, %v2730_v42 }
 0x199   :  { %2186 = vrcp.f32 %v2730_v42 }
 0x19a   :  { %v806_v58 = vpop.f32.mrf.mxu2  ;;  %vm860_vm12 = vcmp.eq.f32.partialorder %v859_v52, 8.507059e+37 }
 0x19b   :  { %v807_v62 = vadd.f32 %v2054_v2, %v806_v58  ;;  %v522_v1 = vpop.f32.mrf.mxu1 }
 0x19c   :  { %v523_v7 = vadd.f32 %v522_v1, %v2641_v3 }
 0x19d   :  { %v2183_v30 = vpop.eup %2182  ;;  %v1898_v4 = vmul.f32 -1.442695, %v807_v62  ;;  %v862_v62 = vor.u32 1.1754944e-38, %v861_v9 }
 0x19e   :  { %v922_v5 = vadd.f32 1.0, %v2183_v30  ;;  %v2185_v31 = vpop.eup %2184 }
 0x19f   :  { %2188 = vpow2.f32 %v1898_v4  ;;  %v2733_v6 = vadd.f32 1.0, %v2185_v31  ;;  %v2737_v28 = vpop.eup %2186 }
 0x1a0   :  { %2190 = vrcp.f32 %v922_v5  ;;  %v851_v50 = vmul.f32 %v2737_v28, %v2730_v42  ;;  %v937_v40 = vand.u32 2147483648, %v922_v5  ;;  %vm856_vm6 = vweird.f32 %v2737_v28 }
 0x1a1   :  { %2192 = vrcp.f32 %v2733_v6  ;;  %vm931_vm7 = vweird.f32 %v922_v5  ;;  %v935_v46 = vand.u32 2147483647, %v922_v5  ;;  %vm2769_vm10 = vmor %vm855_vm8, %vm856_vm6  ;;  %v2062_v42 = vunpack.c.h.bf16 %v2660_v29 }
 0x1a2   :  { %v2735_v43 = vpop.f32.mrf.mxu2  ;;  %v938_v57 = vor.u32 1.1754944e-38, %v937_v40  ;;  %vm870_vm1 = vweird.f32 %v2733_v6  ;;  %v1895_v40 = vmul.f32 -1.442695, %v2720_v24 }
 0x1a3   :  { %v524_v49 = vpop.f32.mrf.mxu1  ;;  %vm936_vm11 = vcmp.eq.f32.partialorder %v935_v46, 8.507059e+37 }
 0x1a4   :  { %v525_v8 = vadd.f32 %v524_v49, %v2651_v16  ;;  %v852_v16 = vsub.f32 1.0, %v851_v50  ;;  %v874_v50 = vand.u32 2147483647, %v2733_v6 }
 0x1a5   :  { %v2189_v27 = vpop.eup %2188 }
 0x1a6   :  { %v2191_v10 = vpop.eup %2190  ;;  %v2742_v12 = vadd.f32 1.0, %v2189_v27  ;;  %v2026_v13 = vpack.c.bf16 %v525_v8, %v523_v7  ;;  %v853_v36 = vmul.f32 %v2737_v28, %v852_v16  ;;  %v2057_v16 = vunpack.c.l.bf16 %v2631_v60 }
 0x1a7   :  { %v927_v14 = vmul.f32 %v2191_v10, %v922_v5  ;;  %v2749_v18 = vpop.eup %2192  ;;  %vm932_vm5 = vweird.f32 %v2191_v10 }
 0x1a8   :  { %2194 = vrcp.f32 %v2742_v12  ;;  %2149 = vst [vmem:[#allocation2 + $0xa0] sm:$0xff] %v2026_v13   ;;  %v866_v23 = vmul.f32 %v2749_v18, %v2733_v6  ;;  %v854_v44 = vadd.f32 %v2737_v28, %v853_v36  ;;  %vm933_vm9 = vmor %vm931_vm7, %vm932_vm5  ;;  %vm871_vm13 = vweird.f32 %v2749_v18 }
 0x1a9   :  { %v928_v15 = vsub.f32 1.0, %v927_v14  ;;  %v952_v31 = vand.u32 2147483648, %v2742_v12  ;;  %vm946_vm15 = vweird.f32 %v2742_v12  ;;  %v876_v13 = vand.u32 2147483648, %v2733_v6  ;;  %vm872_vm2 = vmor %vm870_vm1, %vm871_vm13 }
 0x1aa   :  { %v2747_v17 = vpop.f32.mrf.mxu2  ;;  %v867_v38 = vsub.f32 1.0, %v866_v23  ;;  %v858_v58 = vsel %vm2769_vm10, %v2737_v28, %v854_v44  ;;  %vm875_vm5 = vcmp.eq.f32.partialorder %v874_v50, 8.507059e+37  ;;  %v2058_v6 = vunpack.c.h.bf16 %v2631_v60 }
 0x1ab   :  { %v527_v3 = vpop.f32.mrf.mxu1  ;;  %v929_v20 = vmul.f32 %v2191_v10, %v928_v15  ;;  %v863_v49 = vsel %vm860_vm12, %v862_v62, %v858_v58 }
 0x1ac   :  { %v528_v32 = vadd.f32 %v527_v3, %v2634_v63  ;;  %v953_v3 = vor.u32 1.1754944e-38, %v952_v31 }
 0x1ad   :  { %v930_v56 = vadd.f32 %v2191_v10, %v929_v20  ;;  %v877_v20 = vor.u32 1.1754944e-38, %v876_v13 }
 0x1ae   :  { %v2751_v19 = vpop.eup %2194 }
 0x1af   :  { %v942_v21 = vmul.f32 %v2751_v19, %v2742_v12  ;;  %v934_v54 = vsel %vm933_vm9, %v2191_v10, %v930_v56  ;;  %vm947_vm14 = vweird.f32 %v2751_v19  ;;  %v950_v10 = vand.u32 2147483647, %v2742_v12 }
 0x1b0   :  { %v939_v1 = vsel %vm936_vm11, %v938_v57, %v934_v54  ;;  %vm948_vm0 = vmor %vm946_vm15, %vm947_vm14 }
 0x1b1   :  { %v943_v35 = vsub.f32 1.0, %v942_v21  ;;  %v1066_v27 = vmul.f32 0.0, %v939_v1  ;;  %vm951_vm3 = vcmp.eq.f32.partialorder %v950_v10, 8.507059e+37  ;;  %v2070_v1 = vunpack.c.h.bf16 %v2699_v22 }
 0x1b2   :  { %v814_v53 = vpop.f32.mrf.mxu2  ;;  %v2065_v10 = vunpack.c.l.bf16 %v2689_v0 }
 0x1b3   :  { %v815_v41 = vadd.f32 %v2061_v26, %v814_v53  ;;  %v529_v33 = vpop.f32.mrf.mxu1  ;;  %v944_v63 = vmul.f32 %v2751_v19, %v943_v35 }
 0x1b4   :  { %v530_v47 = vadd.f32 %v529_v33, %v2677_v48  ;;  %v868_v48 = vmul.f32 %v2749_v18, %v867_v38  ;;  %v1896_v33 = vmul.f32 -1.442695, %v2724_v37 }
 0x1b5   :  { %2196 = vtanh.f32 %v815_v41  ;;  %v945_v4 = vadd.f32 %v2751_v19, %v944_v63 }
 0x1b6   :  { %v2031_v55 = vpack.c.bf16 %v530_v47, %v528_v32  ;;  %v869_v28 = vadd.f32 %v2749_v18, %v868_v48  ;;  %v810_v32 = vadd.f32 %v2057_v16, %v2735_v43  ;;  %v2069_v48 = vunpack.c.l.bf16 %v2699_v22 }
 0x1b7   :  { %v949_v15 = vsel %vm948_vm0, %v2751_v19, %v945_v4 }
 0x1b8   :  { %2150 = vst [vmem:[#allocation2 + $0xa8] sm:$0xff] %v2031_v55   ;;  %v873_v12 = vsel %vm872_vm2, %v2749_v18, %v869_v28  ;;  %v954_v23 = vsel %vm951_vm3, %v953_v3, %v949_v15  ;;  %v812_v18 = vadd.f32 %v2058_v6, %v2747_v17  ;;  %v1899_v44 = vmul.f32 -1.442695, %v810_v32 }
 0x1b9   :  { %v878_v19 = vsel %vm875_vm5, %v877_v20, %v873_v12  ;;  %v1067_v53 = vmul.f32 0.0, %v954_v23  ;;  %v2073_v28 = vunpack.c.l.bf16 %v2712_v11  ;;  %v2066_v6 = vunpack.c.h.bf16 %v2689_v0 }
 0x1ba   :  { %v816_v30 = vpop.f32.mrf.mxu2  ;;  %v1900_v60 = vmul.f32 -1.442695, %v812_v18 }
 0x1bb   :  { %v2197_v5 = vpop.eup %2196  ;;  %v817_v7 = vadd.f32 %v2062_v42, %v816_v30  ;;  %v532_v8 = vpop.f32.mrf.mxu1 }
 0x1bc   :  { %v1070_v29 = vmul.f32 %v2197_v5, %v863_v49  ;;  %v533_v21 = vadd.f32 %v532_v8, %v2662_v34 }
 0x1bd   :  { %2198 = vtanh.f32 %v817_v7 }
 0x1be   :  { %v2786_v14 = vadd.f32 %v1070_v29, %v1066_v27  ;;  %2200 = vpow2.f32 %v1895_v40 }
 0x1bf   :  { %2202 = vpow2.f32 %v1896_v33 }
 0x1c0   :  { %2204 = vpow2.f32 %v1899_v44 }
 0x1c1   :  { %2206 = vpow2.f32 %v1900_v60 }
 0x1c2   :  { %v2796_v36 = vpop.f32.mrf.mxu2 }
 0x1c3   :  { %v2199_v26 = vpop.eup %2198  ;;  %v534_v35 = vpop.f32.mrf.mxu1 }
 0x1c4   :  { %v1071_v56 = vmul.f32 %v2199_v26, %v878_v19  ;;  %v535_v38 = vadd.f32 %v534_v35, %v2616_v51  ;;  %v2201_v51 = vpop.eup %2200  ;;  %v2074_v35 = vunpack.c.h.bf16 %v2712_v11 }
 0x1c5   :  { %v2203_v47 = vpop.eup %2202  ;;  %v2808_v63 = vadd.f32 1.0, %v2201_v51 }
 0x1c6   :  { %v2803_v41 = vadd.f32 %v1071_v56, %v1067_v53  ;;  %v2036_v34 = vpack.c.bf16 %v535_v38, %v533_v21  ;;  %v2205_v17 = vpop.eup %2204  ;;  %v2810_v54 = vadd.f32 1.0, %v2203_v47  ;;  %v820_v21 = vadd.f32 %v2065_v10, %v2796_v36 }
 0x1c7   :  { %v2207_v24 = vpop.eup %2206  ;;  %v2814_v57 = vadd.f32 1.0, %v2205_v17  ;;  %2208 = vrcp.f32 %v2808_v63  ;;  %vm885_vm6 = vweird.f32 %v2808_v63  ;;  %v889_v32 = vand.u32 2147483647, %v2808_v63 }
 0x1c8   :  { %2151 = vst [vmem:[#allocation2 + $0xb0] sm:$0xff] %v2036_v34   ;;  %v2816_v2 = vadd.f32 1.0, %v2207_v24  ;;  %2210 = vrcp.f32 %v2810_v54  ;;  %v891_v36 = vand.u32 2147483648, %v2808_v63  ;;  %vm900_vm8 = vweird.f32 %v2810_v54 }
 0x1c9   :  { %2212 = vrcp.f32 %v2814_v57  ;;  %v904_v33 = vand.u32 2147483647, %v2810_v54  ;;  %v906_v44 = vand.u32 2147483648, %v2810_v54  ;;  %v967_v17 = vand.u32 2147483648, %v2814_v57 }
 0x1ca   :  { %v2806_v46 = vpop.f32.mrf.mxu2  ;;  %2214 = vrcp.f32 %v2816_v2  ;;  %vm961_vm13 = vweird.f32 %v2814_v57  ;;  %vm976_vm15 = vweird.f32 %v2816_v2  ;;  %vm890_vm2 = vcmp.eq.f32.partialorder %v889_v32, 8.507059e+37 }
 0x1cb   :  { %v537_v43 = vpop.f32.mrf.mxu1  ;;  %v822_v0 = vadd.f32 %v2066_v6, %v2806_v46  ;;  %vm905_vm5 = vcmp.eq.f32.partialorder %v904_v33, 8.507059e+37 }
 0x1cc   :  { %v538_v37 = vadd.f32 %v537_v43, %v2605_v39 }
 0x1cd   :  { %v2824_v30 = vpop.eup %2208 }
 0x1ce   :  { %v2826_v5 = vpop.eup %2210  ;;  %v881_v7 = vmul.f32 %v2824_v30, %v2808_v63  ;;  %vm886_vm7 = vweird.f32 %v2824_v30 }
 0x1cf   :  { %v2828_v31 = vpop.eup %2212  ;;  %v896_v22 = vmul.f32 %v2826_v5, %v2810_v54  ;;  %vm901_vm9 = vweird.f32 %v2826_v5  ;;  %vm2875_vm11 = vmor %vm885_vm6, %vm886_vm7  ;;  %v980_v54 = vand.u32 2147483647, %v2816_v2 }
 0x1d0   :  { %v2830_v49 = vpop.eup %2214  ;;  %v957_v8 = vmul.f32 %v2828_v31, %v2814_v57  ;;  %v882_v50 = vsub.f32 1.0, %v881_v7  ;;  %vm962_vm10 = vweird.f32 %v2828_v31  ;;  %vm2888_vm14 = vmor %vm900_vm8, %vm901_vm9 }
 0x1d1   :  { %v972_v29 = vmul.f32 %v2830_v49, %v2816_v2  ;;  %v897_v3 = vsub.f32 1.0, %v896_v22  ;;  %vm977_vm12 = vweird.f32 %v2830_v49  ;;  %vm2899_vm0 = vmor %vm961_vm13, %vm962_vm10  ;;  %vm981_vm6 = vcmp.eq.f32.partialorder %v980_v54, 8.507059e+37 }
 0x1d2   :  { %v824_v9 = vpop.f32.mrf.mxu2  ;;  %v958_v20 = vsub.f32 1.0, %v957_v8  ;;  %v883_v26 = vmul.f32 %v2824_v30, %v882_v50  ;;  %vm2914_vm1 = vmor %vm976_vm15, %vm977_vm12 }
 0x1d3   :  { %v539_v52 = vpop.f32.mrf.mxu1  ;;  %v825_v62 = vadd.f32 %v2069_v48, %v824_v9  ;;  %v973_v23 = vsub.f32 1.0, %v972_v29  ;;  %v898_v53 = vmul.f32 %v2826_v5, %v897_v3 }
 0x1d4   :  { %v540_v55 = vadd.f32 %v539_v52, %v2610_v45  ;;  %v959_v38 = vmul.f32 %v2828_v31, %v958_v20  ;;  %v884_v34 = vadd.f32 %v2824_v30, %v883_v26  ;;  %v982_v52 = vand.u32 2147483648, %v2816_v2 }
 0x1d5   :  { %v1901_v42 = vmul.f32 -1.442695, %v825_v62  ;;  %v974_v40 = vmul.f32 %v2830_v49, %v973_v23  ;;  %v899_v43 = vadd.f32 %v2826_v5, %v898_v53  ;;  %v892_v62 = vor.u32 1.1754944e-38, %v891_v36 }
 0x1d6   :  { %v2041_v58 = vpack.c.bf16 %v540_v55, %v538_v37  ;;  %v960_v51 = vadd.f32 %v2828_v31, %v959_v38  ;;  %v965_v37 = vand.u32 2147483647, %v2814_v57  ;;  %v888_v48 = vsel %vm2875_vm11, %v2824_v30, %v884_v34 }
 0x1d7   :  { %v975_v24 = vadd.f32 %v2830_v49, %v974_v40  ;;  %v968_v2 = vor.u32 1.1754944e-38, %v967_v17  ;;  %v907_v30 = vor.u32 1.1754944e-38, %v906_v44  ;;  %v983_v7 = vor.u32 1.1754944e-38, %v982_v52 }
 0x1d8   :  { %2152 = vst [vmem:[#allocation2 + $0xb8] sm:$0xff] %v2041_v58   ;;  %v893_v22 = vsel %vm890_vm2, %v892_v62, %v888_v48  ;;  %vm966_vm3 = vcmp.eq.f32.partialorder %v965_v37, 8.507059e+37 }
 0x1da   :  { %v826_v39 = vpop.f32.mrf.mxu2 }
 0x1db   :  { %v827_v45 = vadd.f32 %v2070_v1, %v826_v39  ;;  %v964_v1 = vsel %vm2899_vm0, %v2828_v31, %v960_v51  ;;  %v903_v39 = vsel %vm2888_vm14, %v2826_v5, %v899_v43 }
 0x1dc   :  { %v908_v8 = vsel %vm905_vm5, %v907_v30, %v903_v39 }
 0x1dd   :  { %v1902_v4 = vmul.f32 -1.442695, %v827_v45 }
 0x1df   :  { %2216 = vpow2.f32 %v1902_v4  ;;  %v979_v4 = vsel %vm2914_vm1, %v2830_v49, %v975_v24 }
 0x1e0   :  { %2218 = vpow2.f32 %v1901_v42 }
 0x1e2   :  { %v829_v27 = vpop.f32.mrf.mxu2 }
 0x1e3   :  { %v830_v13 = vadd.f32 %v2073_v28, %v829_v27  ;;  %v969_v28 = vsel %vm966_vm3, %v968_v2, %v964_v1 }
 0x1e5   :  { %v2217_v15 = vpop.eup %2216  ;;  %v1903_v16 = vmul.f32 -1.442695, %v830_v13  ;;  %v984_v13 = vsel %vm981_vm6, %v983_v7, %v979_v4 }
 0x1e6   :  { %v2219_v12 = vpop.eup %2218  ;;  %v2845_v19 = vadd.f32 1.0, %v2217_v15 }
 0x1e7   :  { %2220 = vpow2.f32 %v1903_v16  ;;  %v2851_v56 = vadd.f32 1.0, %v2219_v12  ;;  %v1068_v16 = vmul.f32 0.0, %v969_v28  ;;  %v1069_v12 = vmul.f32 0.0, %v984_v13  ;;  %v3002_v13 = vld [vmem:[%s3486_s5 + $0x18] sm:$0xff] }
 0x1e8   :  { %2222 = vtanh.f32 %v820_v21  ;;  %vm1026_vm9 = vweird.f32 %v2845_v19  ;;  %v1030_v43 = vand.u32 2147483647, %v2845_v19 }
 0x1e9   :  { %2224 = vrcp.f32 %v2845_v19  ;;  %vm1011_vm14 = vweird.f32 %v2851_v56  ;;  %v1015_v37 = vand.u32 2147483647, %v2851_v56  ;;  %v1017_v63 = vand.u32 2147483648, %v2851_v56 }
 0x1ea   :  { %v831_v18 = vpop.f32.mrf.mxu2  ;;  %2226 = vrcp.f32 %v2851_v56  ;;  %vm1031_vm6 = vcmp.eq.f32.partialorder %v1030_v43, 8.507059e+37 }
 0x1eb   :  { %v832_v11 = vadd.f32 %v2074_v35, %v831_v18  ;;  %2228 = vtanh.f32 %v822_v0  ;;  %v1018_v30 = vor.u32 1.1754944e-38, %v1017_v63 }
 0x1ed   :  { %v2221_v60 = vpop.eup %2220  ;;  %v1904_v46 = vmul.f32 -1.442695, %v832_v11 }
 0x1ee   :  { %v2868_v47 = vadd.f32 1.0, %v2221_v60  ;;  %v2223_v55 = vpop.eup %2222 }
 0x1ef   :  { %2230 = vpow2.f32 %v1904_v46  ;;  %v2904_v58 = vpop.eup %2224  ;;  %v1072_v10 = vmul.f32 %v2223_v55, %v893_v22  ;;  %v1032_v46 = vand.u32 2147483648, %v2845_v19 }
 0x1f0   :  { %2232 = vrcp.f32 %v2868_v47  ;;  %v2918_v42 = vpop.eup %2226  ;;  %v1022_v27 = vmul.f32 %v2904_v58, %v2845_v19  ;;  %v1047_v18 = vand.u32 2147483648, %v2868_v47  ;;  %vm1027_vm10 = vweird.f32 %v2904_v58 }
 0x1f1   :  { %v2229_v31 = vpop.eup %2228  ;;  %v1007_v50 = vmul.f32 %v2918_v42, %v2851_v56  ;;  %v2928_v21 = vadd.f32 %v1072_v10, %v1068_v16  ;;  %vm1012_vm8 = vweird.f32 %v2918_v42  ;;  %vm1041_vm11 = vweird.f32 %v2868_v47  ;;  %vm2960_vm15 = vmor %vm1026_vm9, %vm1027_vm10  ;;  %v2995_v10 = vld [vmem:[%s3486_s5 + $0x10] sm:$0xff]  ;;  %v2076_v16 = vld [vmem:[#allocation2 + $0x40] sm:$0xff]  }
 0x1f2   :  { %v1073_v49 = vmul.f32 %v2229_v31, %v908_v8  ;;  %v1023_v20 = vsub.f32 1.0, %v1022_v27  ;;  %v1045_v11 = vand.u32 2147483647, %v2868_v47  ;;  %v1048_v52 = vor.u32 1.1754944e-38, %v1047_v18  ;;  %vm2966_vm2 = vmor %vm1011_vm14, %vm1012_vm8 }
 0x1f3   :  { %v1008_v26 = vsub.f32 1.0, %v1007_v50  ;;  %v1033_v1 = vor.u32 1.1754944e-38, %v1032_v46  ;;  %v3009_v50 = vld [vmem:[%s3486_s5 + $0x20] sm:$0xff] }
 0x1f4   :  { %v2930_v6 = vadd.f32 %v1073_v49, %v1069_v12  ;;  %v1024_v32 = vmul.f32 %v2904_v58, %v1023_v20  ;;  %vm1046_vm1 = vcmp.eq.f32.partialorder %v1045_v11, 8.507059e+37  ;;  %v2077_v12 = vunpack.c.l.bf16 %v2076_v16 }
 0x1f5   :  { %v2231_v5 = vpop.eup %2230  ;;  %v1009_v38 = vmul.f32 %v2918_v42, %v1008_v26 }
 0x1f6   :  { %v2233_v29 = vpop.eup %2232  ;;  %v1005_v15 = vadd.f32 1.0, %v2231_v5  ;;  %v1025_v34 = vadd.f32 %v2904_v58, %v1024_v32  ;;  %v2078_v32 = vunpack.c.h.bf16 %v2076_v16 }
 0x1f7   :  { %v1037_v3 = vmul.f32 %v2233_v29, %v2868_v47  ;;  %vm1042_vm7 = vweird.f32 %v2233_v29  ;;  %v1010_v60 = vadd.f32 %v2918_v42, %v1009_v38 }
 0x1f8   :  { %2234 = vrcp.f32 %v1005_v15  ;;  %vm2944_vm12 = vmor %vm1041_vm11, %vm1042_vm7  ;;  %v1062_v44 = vand.u32 2147483648, %v1005_v15  ;;  %v1060_v47 = vand.u32 2147483647, %v1005_v15  ;;  %vm1056_vm0 = vweird.f32 %v1005_v15 }
 0x1f9   :  { %v1038_v23 = vsub.f32 1.0, %v1037_v3  ;;  %2236 = vtanh.f32 %v2803_v41  ;;  %v1029_v56 = vsel %vm2960_vm15, %v2904_v58, %v1025_v34  ;;  %v1014_v45 = vsel %vm2966_vm2, %v2918_v42, %v1010_v60  ;;  %v2988_v42 = vld [vmem:[%s3486_s5 + $0x8] sm:$0xff] }
 0x1fa   :  { %2238 = vtanh.f32 %v2928_v21  ;;  %v1063_v62 = vor.u32 1.1754944e-38, %v1062_v44  ;;  %vm1061_vm5 = vcmp.eq.f32.partialorder %v1060_v47, 8.507059e+37  ;;  %v1034_v4 = vsel %vm1031_vm6, %v1033_v1, %v1029_v56 }
 0x1fb   :  { %v1039_v35 = vmul.f32 %v2233_v29, %v1038_v23  ;;  %2240 = vtanh.f32 %v2930_v6  ;;  %vm1016_vm7 = vcmp.eq.f32.partialorder %v1015_v37, 8.507059e+37 }
 0x1fc   :  { %2242 = vtanh.f32 %v2786_v14  ;;  %v1019_v58 = vsel %vm1016_vm7, %v1018_v30, %v1014_v45 }
 0x1fd   :  { %v1040_v0 = vadd.f32 %v2233_v29, %v1039_v35  ;;  %v2161_v35 = vld [vmem:[#allocation2 + $0x50] sm:$0xff]  }
 0x1fe   :  { %v2235_v53 = vpop.eup %2234  ;;  %v2086_v18 = vunpack.c.h.bf16 %v2161_v35 }
 0x1ff   :  { %v1052_v36 = vmul.f32 %v2235_v53, %v1005_v15  ;;  %v2237_v51 = vpop.eup %2236  ;;  %v1044_v9 = vsel %vm2944_vm12, %v2233_v29, %v1040_v0  ;;  %vm1057_vm13 = vweird.f32 %v2235_v53  ;;  %v2981_v29 = vld [vmem:[%s3486_s5] sm:$0xff] }
 0x200   :  { %v2239_v24 = vpop.eup %2238  ;;  %v1049_v19 = vsel %vm1046_vm1, %v1048_v52, %v1044_v9  ;;  %vm1058_vm3 = vmor %vm1056_vm0, %vm1057_vm13  ;;  %v1083_v5 = vmul.f32 %v2237_v51, %v1034_v4 }
 0x201   :  { %v1053_v40 = vsub.f32 1.0, %v1052_v36  ;;  %v2241_v48 = vpop.eup %2240  ;;  %v1084_v31 = vmul.f32 %v2239_v24, %v1049_v19  ;;  %v2163_v19 = vld [vmem:[#allocation2 + $0x60] sm:$0xff]  }
 0x202   :  { %v2243_v28 = vpop.eup %2242  ;;  %v2093_v45 = vunpack.c.l.bf16 %v2163_v19 }
 0x203   :  { %v1054_v17 = vmul.f32 %v2235_v53, %v1053_v40  ;;  %v1082_v8 = vmul.f32 %v2243_v28, %v1019_v58 }
 0x205   :  { %v1055_v57 = vadd.f32 %v2235_v53, %v1054_v17  ;;  %v1086_v27 = vpack.c.bf16 %v1083_v5, %v1082_v8 }
 0x207   :  { %v1059_v39 = vsel %vm1058_vm3, %v2235_v53, %v1055_v57  ;;  %v2085_v53 = vunpack.c.l.bf16 %v2161_v35  ;;  %v2094_v35 = vunpack.c.h.bf16 %v2163_v19 }
 0x208   :  { %v1064_v2 = vsel %vm1061_vm5, %v1063_v62, %v1059_v39 }
 0x209   :  { %v1085_v7 = vmul.f32 %v2241_v48, %v1064_v2 }
 0x20b   :  { %v1087_v22 = vpack.c.bf16 %v1085_v7, %v1084_v31 }
 0x20d   :  { %1126 = vmatpush.bf16.msra.mxu3 %v1087_v22 }
 0x211   :  { %1127 = vmatpush.bf16.msra.mxu3 %v1086_v27 }
 0x214   :  { %1905 = vmatmul.msk.bf16.vlgmr.msra.gmra.mxu3 %vm760_vm4, %v2981_v29 }
 0x224   :  { %1906 = vmatmul.msk.bf16.gmra.mxu3 %vm760_vm4, %v2988_v42 }
 0x234   :  { %1907 = vmatmul.msk.bf16.gmra.mxu3 %vm760_vm4, %v2995_v10 }
 0x244   :  { %1908 = vmatmul.msk.bf16.gmra.mxu3 %vm760_vm4, %v3002_v13 }
 0x254   :  { %1909 = vmatmul.msk.bf16.gmra.mxu3 %vm760_vm4, %v3009_v50 }
 0x264   :  { %1910 = vmatmul.msk.bf16.gmra.mxu3 %vm760_vm4, %v2627_v59 }
 0x274   :  { %1911 = vmatmul.msk.bf16.gmra.mxu3 %vm760_vm4, %v2658_v25 }
 0x284   :  { %1912 = vmatmul.msk.bf16.gmra.mxu3 %vm760_vm4, %v2687_v61 }
 0x297   :  { %v1129_v15 = vpop.f32.mrf.mxu3 }
 0x298   :  { %v1130_v20 = vadd.f32 %v2077_v12, %v1129_v15 }
 0x29a   :  { %v1913_v26 = vmul.f32 -1.442695, %v1130_v20 }
 0x29c   :  { %2244 = vpow2.f32 %v1913_v26 }
 0x29f   :  { %v1131_v49 = vpop.f32.mrf.mxu3 }
 0x2a0   :  { %v1132_v59 = vadd.f32 %v2078_v32, %v1131_v49 }
 0x2a2   :  { %v1914_v36 = vmul.f32 -1.442695, %v1132_v59  ;;  %v2245_v61 = vpop.eup %2244 }
 0x2a3   :  { %v1181_v40 = vadd.f32 1.0, %v2245_v61 }
 0x2a5   :  { %v1196_v28 = vand.u32 2147483648, %v1181_v40  ;;  %vm1190_vm12 = vweird.f32 %v1181_v40  ;;  %v1194_v27 = vand.u32 2147483647, %v1181_v40 }
 0x2a7   :  { %v3019_v3 = vpop.f32.mrf.mxu3  ;;  %v1197_v20 = vor.u32 1.1754944e-38, %v1196_v28  ;;  %vm1195_vm0 = vcmp.eq.f32.partialorder %v1194_v27, 8.507059e+37  ;;  %v2165_v28 = vld [vmem:[#allocation2 + $0x70] sm:$0xff]  }
 0x2af   :  { %v3021_v23 = vpop.f32.mrf.mxu3 }
 0x2b7   :  { %v1139_v38 = vpop.f32.mrf.mxu3 }
 0x2b8   :  { %v1140_v25 = vadd.f32 %v2085_v53, %v1139_v38 }
 0x2ba   :  { %v1917_v0 = vmul.f32 -1.442695, %v1140_v25 }
 0x2bc   :  { %2246 = vpow2.f32 %v1917_v0 }
 0x2bd   :  { %2248 = vpow2.f32 %v1914_v36 }
 0x2be   :  { %2250 = vrcp.f32 %v1181_v40 }
 0x2bf   :  { %v1141_v11 = vpop.f32.mrf.mxu3 }
 0x2c0   :  { %v1142_v34 = vadd.f32 %v2086_v18, %v1141_v11  ;;  %v2160_v11 = vld [vmem:[#allocation2 + $0x48] sm:$0xff]  }
 0x2c2   :  { %v2247_v33 = vpop.eup %2246  ;;  %v1918_v44 = vmul.f32 -1.442695, %v1142_v34 }
 0x2c3   :  { %v1257_v60 = vadd.f32 1.0, %v2247_v33  ;;  %v2249_v43 = vpop.eup %2248 }
 0x2c4   :  { %2252 = vpow2.f32 %v1918_v44  ;;  %v3023_v46 = vadd.f32 1.0, %v2249_v43  ;;  %v2251_v17 = vpop.eup %2250 }
 0x2c5   :  { %2254 = vrcp.f32 %v1257_v60  ;;  %v1186_v37 = vmul.f32 %v2251_v17, %v1181_v40  ;;  %v1272_v7 = vand.u32 2147483648, %v1257_v60  ;;  %vm1266_vm9 = vweird.f32 %v1257_v60 }
 0x2c6   :  { %2256 = vrcp.f32 %v3023_v46  ;;  %vm1191_vm10 = vweird.f32 %v2251_v17  ;;  %v1270_v5 = vand.u32 2147483647, %v1257_v60  ;;  %v1211_v33 = vand.u32 2147483648, %v3023_v46 }
 0x2c7   :  { %v3025_v51 = vpop.f32.mrf.mxu3  ;;  %v1187_v57 = vsub.f32 1.0, %v1186_v37  ;;  %v1273_v49 = vor.u32 1.1754944e-38, %v1272_v7  ;;  %vm1192_vm13 = vmor %vm1190_vm12, %vm1191_vm10  ;;  %vm1205_vm5 = vweird.f32 %v3023_v46 }
 0x2c8   :  { %vm1271_vm14 = vcmp.eq.f32.partialorder %v1270_v5, 8.507059e+37 }
 0x2c9   :  { %v1188_v39 = vmul.f32 %v2251_v17, %v1187_v57 }
 0x2ca   :  { %v2253_v9 = vpop.eup %2252 }
 0x2cb   :  { %v2255_v47 = vpop.eup %2254  ;;  %v3028_v24 = vadd.f32 1.0, %v2253_v9  ;;  %v1189_v22 = vadd.f32 %v2251_v17, %v1188_v39  ;;  %v2081_v9 = vunpack.c.l.bf16 %v2160_v11 }
 0x2cc   :  { %v1262_v52 = vmul.f32 %v2255_v47, %v1257_v60  ;;  %v3033_v48 = vpop.eup %2256  ;;  %vm1267_vm8 = vweird.f32 %v2255_v47  ;;  %v1209_v60 = vand.u32 2147483647, %v3023_v46 }
 0x2cd   :  { %2258 = vrcp.f32 %v3028_v24  ;;  %v1201_v62 = vmul.f32 %v3033_v48, %v3023_v46  ;;  %vm1268_vm11 = vmor %vm1266_vm9, %vm1267_vm8  ;;  %v1193_v12 = vsel %vm1192_vm13, %v2251_v17, %v1189_v22  ;;  %vm1206_vm1 = vweird.f32 %v3033_v48  ;;  %v2162_v17 = vld [vmem:[#allocation2 + $0x58] sm:$0xff]  }
 0x2ce   :  { %v1263_v63 = vsub.f32 1.0, %v1262_v52  ;;  %v1287_v38 = vand.u32 2147483648, %v3028_v24  ;;  %v1198_v25 = vsel %vm1195_vm0, %v1197_v20, %v1193_v12  ;;  %vm1281_vm2 = vweird.f32 %v3028_v24  ;;  %vm1207_vm6 = vmor %vm1205_vm5, %vm1206_vm1 }
 0x2cf   :  { %v3031_v55 = vpop.f32.mrf.mxu3  ;;  %v1202_v31 = vsub.f32 1.0, %v1201_v62  ;;  %v1285_v40 = vand.u32 2147483647, %v3028_v24  ;;  %v1212_v52 = vor.u32 1.1754944e-38, %v1211_v33  ;;  %v2089_v57 = vunpack.c.l.bf16 %v2162_v17 }
 0x2d0   :  { %v1264_v56 = vmul.f32 %v2255_v47, %v1263_v63  ;;  %v1288_v43 = vor.u32 1.1754944e-38, %v1287_v38  ;;  %v1135_v63 = vadd.f32 %v2081_v9, %v3019_v3  ;;  %vm1210_vm8 = vcmp.eq.f32.partialorder %v1209_v60, 8.507059e+37 }
 0x2d1   :  { %v1203_v16 = vmul.f32 %v3033_v48, %v1202_v31  ;;  %vm1286_vm7 = vcmp.eq.f32.partialorder %v1285_v40, 8.507059e+37  ;;  %v2090_v19 = vunpack.c.h.bf16 %v2162_v17  ;;  %v2164_v40 = vld [vmem:[#allocation2 + $0x68] sm:$0xff]  }
 0x2d2   :  { %v1265_v4 = vadd.f32 %v2255_v47, %v1264_v56  ;;  %v2097_v17 = vunpack.c.l.bf16 %v2164_v40 }
 0x2d3   :  { %v3035_v54 = vpop.eup %2258  ;;  %v1204_v0 = vadd.f32 %v3033_v48, %v1203_v16  ;;  %v2102_v16 = vunpack.c.h.bf16 %v2165_v28 }
 0x2d4   :  { %v1277_v1 = vmul.f32 %v3035_v54, %v3028_v24  ;;  %v1269_v15 = vsel %vm1268_vm11, %v2255_v47, %v1265_v4  ;;  %vm1282_vm15 = vweird.f32 %v3035_v54  ;;  %v2082_v24 = vunpack.c.h.bf16 %v2160_v11 }
 0x2d5   :  { %v1274_v26 = vsel %vm1271_vm14, %v1273_v49, %v1269_v15  ;;  %vm3053_vm3 = vmor %vm1281_vm2, %vm1282_vm15  ;;  %v1208_v47 = vsel %vm1207_vm6, %v3033_v48, %v1204_v0  ;;  %v2101_v15 = vunpack.c.l.bf16 %v2165_v28 }
 0x2d6   :  { %v1278_v2 = vsub.f32 1.0, %v1277_v1  ;;  %v1401_v61 = vmul.f32 %v1274_v26, %v2786_v14  ;;  %v1213_v62 = vsel %vm1210_vm8, %v1212_v52, %v1208_v47  ;;  %v1145_v1 = vadd.f32 %v2089_v57, %v3025_v51 }
 0x2d7   :  { %v1149_v30 = vpop.f32.mrf.mxu3  ;;  %v2098_v57 = vunpack.c.h.bf16 %v2164_v40 }
 0x2d8   :  { %v1150_v58 = vadd.f32 %v2093_v45, %v1149_v30  ;;  %v1279_v8 = vmul.f32 %v3035_v54, %v1278_v2  ;;  %v1147_v45 = vadd.f32 %v2090_v19, %v3031_v55  ;;  %v1915_v2 = vmul.f32 -1.442695, %v1135_v63 }
 0x2d9   :  { %v1919_v4 = vmul.f32 -1.442695, %v1145_v1 }
 0x2da   :  { %2260 = vtanh.f32 %v1150_v58  ;;  %v1280_v59 = vadd.f32 %v3035_v54, %v1279_v8  ;;  %v1920_v31 = vmul.f32 -1.442695, %v1147_v45 }
 0x2dc   :  { %v1284_v14 = vsel %vm3053_vm3, %v3035_v54, %v1280_v59  ;;  %v1137_v54 = vadd.f32 %v2082_v24, %v3021_v23 }
 0x2dd   :  { %v1289_v37 = vsel %vm1286_vm7, %v1288_v43, %v1284_v14 }
 0x2de   :  { %v1402_v39 = vmul.f32 %v1289_v37, %v2803_v41  ;;  %v1916_v3 = vmul.f32 -1.442695, %v1137_v54 }
 0x2df   :  { %v1151_v32 = vpop.f32.mrf.mxu3 }
 0x2e0   :  { %v2261_v53 = vpop.eup %2260  ;;  %v1152_v36 = vadd.f32 %v2094_v35, %v1151_v32 }
 0x2e1   :  { %v1405_v18 = vmul.f32 %v2261_v53, %v1198_v25  ;;  %v2166_v53 = vld [vmem:[#allocation2 + $0x78] sm:$0xff]  }
 0x2e2   :  { %2262 = vtanh.f32 %v1152_v36  ;;  %v2106_v54 = vunpack.c.h.bf16 %v2166_v53 }
 0x2e3   :  { %v3058_v44 = vadd.f32 %v1405_v18, %v1401_v61  ;;  %2264 = vpow2.f32 %v1915_v2  ;;  %v2105_v61 = vunpack.c.l.bf16 %v2166_v53 }
 0x2e4   :  { %2266 = vpow2.f32 %v1916_v3 }
 0x2e5   :  { %2268 = vpow2.f32 %v1919_v4 }
 0x2e6   :  { %2270 = vpow2.f32 %v1920_v31 }
 0x2e7   :  { %v3069_v46 = vpop.f32.mrf.mxu3 }
 0x2e8   :  { %v2263_v56 = vpop.eup %2262  ;;  %v1155_v37 = vadd.f32 %v2097_v17, %v3069_v46 }
 0x2e9   :  { %v1406_v48 = vmul.f32 %v2263_v56, %v1213_v62  ;;  %v2265_v23 = vpop.eup %2264 }
 0x2ea   :  { %v2267_v58 = vpop.eup %2266  ;;  %v3077_v41 = vadd.f32 1.0, %v2265_v23 }
 0x2eb   :  { %v3075_v30 = vadd.f32 %v1406_v48, %v1402_v39  ;;  %v2269_v22 = vpop.eup %2268  ;;  %v3079_v55 = vadd.f32 1.0, %v2267_v58 }
 0x2ec   :  { %v2271_v5 = vpop.eup %2270  ;;  %v3081_v8 = vadd.f32 1.0, %v2269_v22  ;;  %2272 = vrcp.f32 %v3077_v41  ;;  %vm1220_vm9 = vweird.f32 %v3077_v41  ;;  %v1224_v19 = vand.u32 2147483647, %v3077_v41 }
 0x2ed   :  { %v3083_v27 = vadd.f32 1.0, %v2271_v5  ;;  %2274 = vrcp.f32 %v3079_v55  ;;  %v1226_v46 = vand.u32 2147483648, %v3077_v41  ;;  %vm1235_vm11 = vweird.f32 %v3079_v55 }
 0x2ee   :  { %2276 = vrcp.f32 %v3081_v8  ;;  %v1239_v31 = vand.u32 2147483647, %v3079_v55  ;;  %v1241_v23 = vand.u32 2147483648, %v3079_v55  ;;  %v1302_v28 = vand.u32 2147483648, %v3081_v8 }
 0x2ef   :  { %v1156_v7 = vpop.f32.mrf.mxu3  ;;  %2278 = vrcp.f32 %v3083_v27  ;;  %vm1296_vm0 = vweird.f32 %v3081_v8  ;;  %vm1311_vm3 = vweird.f32 %v3083_v27  ;;  %vm1225_vm6 = vcmp.eq.f32.partialorder %v1224_v19, 8.507059e+37 }
 0x2f0   :  { %v1157_v48 = vadd.f32 %v2098_v57, %v1156_v7  ;;  %vm1240_vm8 = vcmp.eq.f32.partialorder %v1239_v31, 8.507059e+37 }
 0x2f2   :  { %v3089_v35 = vpop.eup %2272 }
 0x2f3   :  { %v3091_v59 = vpop.eup %2274  ;;  %v1216_v36 = vmul.f32 %v3089_v35, %v3077_v41  ;;  %vm1221_vm10 = vweird.f32 %v3089_v35 }
 0x2f4   :  { %v3093_v38 = vpop.eup %2276  ;;  %v1231_v0 = vmul.f32 %v3091_v59, %v3079_v55  ;;  %vm1236_vm12 = vweird.f32 %v3091_v59  ;;  %vm3136_vm15 = vmor %vm1220_vm9, %vm1221_vm10  ;;  %v1315_v55 = vand.u32 2147483647, %v3083_v27 }
 0x2f5   :  { %v3095_v25 = vpop.eup %2278  ;;  %v1292_v18 = vmul.f32 %v3093_v38, %v3081_v8  ;;  %v1217_v60 = vsub.f32 1.0, %v1216_v36  ;;  %vm1297_vm13 = vweird.f32 %v3093_v38  ;;  %vm3148_vm1 = vmor %vm1235_vm11, %vm1236_vm12  ;;  %v1227_v36 = vor.u32 1.1754944e-38, %v1226_v46 }
 0x2f6   :  { %v1307_v34 = vmul.f32 %v3095_v25, %v3083_v27  ;;  %v1232_v43 = vsub.f32 1.0, %v1231_v0  ;;  %vm1312_vm14 = vweird.f32 %v3095_v25  ;;  %vm3155_vm2 = vmor %vm1296_vm0, %vm1297_vm13  ;;  %vm1316_vm9 = vcmp.eq.f32.partialorder %v1315_v55, 8.507059e+37 }
 0x2f7   :  { %v1159_v51 = vpop.f32.mrf.mxu3  ;;  %v1293_v24 = vsub.f32 1.0, %v1292_v18  ;;  %v1218_v63 = vmul.f32 %v3089_v35, %v1217_v60  ;;  %vm3168_vm5 = vmor %vm1311_vm3, %vm1312_vm14  ;;  %v1242_v18 = vor.u32 1.1754944e-38, %v1241_v23 }
 0x2f8   :  { %v1160_v49 = vadd.f32 %v2101_v15, %v1159_v51  ;;  %v1308_v52 = vsub.f32 1.0, %v1307_v34  ;;  %v1233_v62 = vmul.f32 %v3091_v59, %v1232_v43 }
 0x2f9   :  { %v1294_v39 = vmul.f32 %v3093_v38, %v1293_v24  ;;  %v1219_v4 = vadd.f32 %v3089_v35, %v1218_v63 }
 0x2fa   :  { %v1921_v26 = vmul.f32 -1.442695, %v1160_v49  ;;  %v1309_v2 = vmul.f32 %v3095_v25, %v1308_v52  ;;  %v1234_v22 = vadd.f32 %v3091_v59, %v1233_v62 }
 0x2fb   :  { %v1295_v51 = vadd.f32 %v3093_v38, %v1294_v39 }
 0x2fc   :  { %v1310_v49 = vadd.f32 %v3095_v25, %v1309_v2 }
 0x2fd   :  { %v1299_v0 = vsel %vm3155_vm2, %v3093_v38, %v1295_v51 }
 0x2fe   :  { %v1314_v40 = vsel %vm3168_vm5, %v3095_v25, %v1310_v49 }
 0x2ff   :  { %v1161_v12 = vpop.f32.mrf.mxu3 }
 0x300   :  { %v1162_v20 = vadd.f32 %v2102_v16, %v1161_v12  ;;  %v1317_v16 = vand.u32 2147483648, %v3083_v27  ;;  %v1300_v12 = vand.u32 2147483647, %v3081_v8  ;;  %v1223_v8 = vsel %vm3136_vm15, %v3089_v35, %v1219_v4 }
 0x301   :  { %v1303_v27 = vor.u32 1.1754944e-38, %v1302_v28 }
 0x302   :  { %v1922_v32 = vmul.f32 -1.442695, %v1162_v20  ;;  %v1318_v34 = vor.u32 1.1754944e-38, %v1317_v16  ;;  %vm1301_vm7 = vcmp.eq.f32.partialorder %v1300_v12, 8.507059e+37 }
 0x303   :  { %v1304_v38 = vsel %vm1301_vm7, %v1303_v27, %v1299_v0 }
 0x304   :  { %2280 = vpow2.f32 %v1922_v32 }
 0x305   :  { %2282 = vpow2.f32 %v1921_v26 }
 0x307   :  { %v1164_v11 = vpop.f32.mrf.mxu3 }
 0x308   :  { %v1165_v33 = vadd.f32 %v2105_v61, %v1164_v11  ;;  %v1238_v61 = vsel %vm3148_vm1, %v3091_v59, %v1234_v22 }
 0x30a   :  { %v2281_v14 = vpop.eup %2280  ;;  %v1923_v9 = vmul.f32 -1.442695, %v1165_v33  ;;  %v1228_v33 = vsel %vm1225_vm6, %v1227_v36, %v1223_v8  ;;  %v2170_v36 = vld [vmem:[#allocation2 + $0xa0] sm:$0xff]  }
 0x30b   :  { %v2283_v47 = vpop.eup %2282  ;;  %v3107_v56 = vadd.f32 1.0, %v2281_v14  ;;  %v1243_v14 = vsel %vm1240_vm8, %v1242_v18, %v1238_v61 }
 0x30c   :  { %2284 = vpow2.f32 %v1923_v9  ;;  %v3112_v1 = vadd.f32 1.0, %v2283_v47  ;;  %v1319_v9 = vsel %vm1316_vm9, %v1318_v34, %v1314_v40 }
 0x30d   :  { %2286 = vtanh.f32 %v1155_v37  ;;  %v1403_v37 = vmul.f32 %v1304_v38, %v2928_v21  ;;  %v1404_v63 = vmul.f32 %v1319_v9, %v2930_v6  ;;  %vm1361_vm12 = vweird.f32 %v3107_v56  ;;  %v2108_v9 = vld [vmem:[#allocation2 + $0x80] sm:$0xff]  }
 0x30e   :  { %2288 = vrcp.f32 %v3107_v56  ;;  %v1365_v51 = vand.u32 2147483647, %v3107_v56  ;;  %v1367_v28 = vand.u32 2147483648, %v3107_v56  ;;  %vm1346_vm1 = vweird.f32 %v3112_v1 }
 0x30f   :  { %v1166_v45 = vpop.f32.mrf.mxu3  ;;  %2290 = vrcp.f32 %v3112_v1  ;;  %v1352_v26 = vand.u32 2147483648, %v3112_v1 }
 0x310   :  { %v1167_v3 = vadd.f32 %v2106_v54, %v1166_v45  ;;  %2292 = vtanh.f32 %v1157_v48  ;;  %v1368_v61 = vor.u32 1.1754944e-38, %v1367_v28  ;;  %vm1366_vm9 = vcmp.eq.f32.partialorder %v1365_v51, 8.507059e+37 }
 0x312   :  { %v2285_v58 = vpop.eup %2284  ;;  %v1924_v7 = vmul.f32 -1.442695, %v1167_v3 }
 0x313   :  { %v3128_v5 = vadd.f32 1.0, %v2285_v58  ;;  %v2287_v41 = vpop.eup %2286 }
 0x314   :  { %2294 = vpow2.f32 %v1924_v7  ;;  %v3164_v32 = vpop.eup %2288  ;;  %v1407_v17 = vmul.f32 %v2287_v41, %v1228_v33  ;;  %v1350_v41 = vand.u32 2147483647, %v3112_v1 }
 0x315   :  { %2296 = vrcp.f32 %v3128_v5  ;;  %v3178_v35 = vpop.eup %2290  ;;  %v1357_v59 = vmul.f32 %v3164_v32, %v3107_v56  ;;  %v1382_v3 = vand.u32 2147483648, %v3128_v5  ;;  %vm1362_vm13 = vweird.f32 %v3164_v32 }
 0x316   :  { %v2293_v11 = vpop.eup %2292  ;;  %v1342_v47 = vmul.f32 %v3178_v35, %v3112_v1  ;;  %v3190_v19 = vadd.f32 %v1407_v17, %v1403_v37  ;;  %vm1347_vm11 = vweird.f32 %v3178_v35  ;;  %vm1376_vm14 = vweird.f32 %v3128_v5  ;;  %vm3222_vm2 = vmor %vm1361_vm12, %vm1362_vm13  ;;  %v2168_v37 = vld [vmem:[#allocation2 + $0x90] sm:$0xff]  }
 0x317   :  { %v1408_v25 = vmul.f32 %v2293_v11, %v1243_v14  ;;  %v1358_v57 = vsub.f32 1.0, %v1357_v59  ;;  %v1380_v31 = vand.u32 2147483647, %v3128_v5  ;;  %v1383_v20 = vor.u32 1.1754944e-38, %v1382_v3  ;;  %vm3228_vm6 = vmor %vm1346_vm1, %vm1347_vm11 }
 0x318   :  { %v1343_v62 = vsub.f32 1.0, %v1342_v47  ;;  %v1353_v11 = vor.u32 1.1754944e-38, %v1352_v26  ;;  %v2109_v47 = vunpack.c.l.bf16 %v2108_v9 }
 0x319   :  { %v3192_v39 = vadd.f32 %v1408_v25, %v1404_v63  ;;  %v1359_v48 = vmul.f32 %v3164_v32, %v1358_v57  ;;  %vm1381_vm5 = vcmp.eq.f32.partialorder %v1380_v31, 8.507059e+37  ;;  %v2110_v63 = vunpack.c.h.bf16 %v2108_v9 }
 0x31a   :  { %v2295_v60 = vpop.eup %2294  ;;  %v1344_v21 = vmul.f32 %v3178_v35, %v1343_v62 }
 0x31b   :  { %v2297_v43 = vpop.eup %2296  ;;  %v1340_v24 = vadd.f32 1.0, %v2295_v60  ;;  %v1360_v23 = vadd.f32 %v3164_v32, %v1359_v48 }
 0x31c   :  { %v1372_v52 = vmul.f32 %v2297_v43, %v3128_v5  ;;  %vm1377_vm10 = vweird.f32 %v2297_v43  ;;  %v1345_v7 = vadd.f32 %v3178_v35, %v1344_v21 }
 0x31d   :  { %2298 = vrcp.f32 %v1340_v24  ;;  %vm3206_vm15 = vmor %vm1376_vm14, %vm1377_vm10  ;;  %v1397_v22 = vand.u32 2147483648, %v1340_v24  ;;  %v1395_v5 = vand.u32 2147483647, %v1340_v24  ;;  %vm1391_vm3 = vweird.f32 %v1340_v24 }
 0x31e   :  { %v1373_v54 = vsub.f32 1.0, %v1372_v52  ;;  %2300 = vtanh.f32 %v3075_v30  ;;  %v1364_v1 = vsel %vm3222_vm2, %v3164_v32, %v1360_v23  ;;  %v1349_v18 = vsel %vm3228_vm6, %v3178_v35, %v1345_v7  ;;  %v2377_v35 = vld [vmem:[%s3486_s5 + $0x28] sm:$0xff] }
 0x31f   :  { %2302 = vtanh.f32 %v3190_v19  ;;  %v1398_v0 = vor.u32 1.1754944e-38, %v1397_v22  ;;  %vm1396_vm8 = vcmp.eq.f32.partialorder %v1395_v5, 8.507059e+37  ;;  %v1369_v34 = vsel %vm1366_vm9, %v1368_v61, %v1364_v1 }
 0x320   :  { %v1374_v46 = vmul.f32 %v2297_v43, %v1373_v54  ;;  %2304 = vtanh.f32 %v3192_v39  ;;  %vm1351_vm10 = vcmp.eq.f32.partialorder %v1350_v41, 8.507059e+37  ;;  %v2117_v54 = vunpack.c.l.bf16 %v2168_v37 }
 0x321   :  { %2306 = vtanh.f32 %v3058_v44  ;;  %v1354_v32 = vsel %vm1351_vm10, %v1353_v11, %v1349_v18  ;;  %v2125_v61 = vunpack.c.l.bf16 %v2170_v36 }
 0x322   :  { %v1375_v2 = vadd.f32 %v2297_v43, %v1374_v46 }
 0x323   :  { %v2299_v45 = vpop.eup %2298 }
 0x324   :  { %v1387_v6 = vmul.f32 %v2299_v45, %v1340_v24  ;;  %v2301_v15 = vpop.eup %2300  ;;  %v1379_v16 = vsel %vm3206_vm15, %v2297_v43, %v1375_v2  ;;  %vm1392_vm0 = vweird.f32 %v2299_v45 }
 0x325   :  { %v2303_v12 = vpop.eup %2302  ;;  %v1384_v56 = vsel %vm1381_vm5, %v1383_v20, %v1379_v16  ;;  %vm1393_vm7 = vmor %vm1391_vm3, %vm1392_vm0  ;;  %v1418_v14 = vmul.f32 %v2301_v15, %v1369_v34 }
 0x326   :  { %v1388_v4 = vsub.f32 1.0, %v1387_v6  ;;  %v2305_v55 = vpop.eup %2304  ;;  %v1419_v33 = vmul.f32 %v2303_v12, %v1384_v56  ;;  %v2118_v6 = vunpack.c.h.bf16 %v2168_v37 }
 0x327   :  { %v2307_v59 = vpop.eup %2306 }
 0x328   :  { %v1389_v49 = vmul.f32 %v2299_v45, %v1388_v4  ;;  %v1417_v43 = vmul.f32 %v2307_v59, %v1354_v32 }
 0x32a   :  { %v1390_v53 = vadd.f32 %v2299_v45, %v1389_v49  ;;  %v1421_v17 = vpack.c.bf16 %v1418_v14, %v1417_v43 }
 0x32c   :  { %v1394_v27 = vsel %vm1393_vm7, %v2299_v45, %v1390_v53 }
 0x32d   :  { %v1399_v40 = vsel %vm1396_vm8, %v1398_v0, %v1394_v27 }
 0x32e   :  { %v1420_v60 = vmul.f32 %v2305_v55, %v1399_v40 }
 0x330   :  { %v1422_v38 = vpack.c.bf16 %v1420_v60, %v1419_v33  ;;  %v2167_v60 = vld [vmem:[#allocation2 + $0x88] sm:$0xff]  }
 0x331   :  { %v2114_v9 = vunpack.c.h.bf16 %v2167_v60 }
 0x332   :  { %1461 = vmatpush.bf16.msrb.mxu0 %v1422_v38 }
 0x336   :  { %1462 = vmatpush.bf16.msrb.mxu0 %v1421_v17 }
 0x339   :  { %1925 = vmatmul.msk.bf16.vlgmr.msrb.gmra.mxu0 %vm760_vm4, %v2981_v29  ;;  %v2378_v29 = vld [vmem:[%s3486_s5 + $0x30] sm:$0xff] }
 0x349   :  { %1926 = vmatmul.msk.bf16.gmra.mxu0 %vm760_vm4, %v2988_v42  ;;  %v2379_v42 = vld [vmem:[%s3486_s5 + $0x38] sm:$0xff] }
 0x359   :  { %1927 = vmatmul.msk.bf16.gmra.mxu0 %vm760_vm4, %v2995_v10 }
 0x369   :  { %1928 = vmatmul.msk.bf16.gmra.mxu0 %vm760_vm4, %v3002_v13 }
 0x379   :  { %1929 = vmatmul.msk.bf16.gmra.mxu0 %vm760_vm4, %v3009_v50 }
 0x389   :  { %1930 = vmatmul.msk.bf16.gmra.mxu0 %vm760_vm4, %v2377_v35 }
 0x399   :  { %1931 = vmatmul.msk.bf16.gmra.mxu0 %vm760_vm4, %v2378_v29  ;;  %v2113_v29 = vunpack.c.l.bf16 %v2167_v60 }
 0x3a9   :  { %1932 = vmatmul.msk.bf16.gmra.mxu0 %vm760_vm4, %v2379_v42 }
 0x3b6   :  { %v1464_v10 = vpop.f32.mrf.mxu0 }
 0x3b7   :  { %v1465_v24 = vadd.f32 %v2109_v47, %v1464_v10 }
 0x3b9   :  { %v1933_v52 = vmul.f32 -1.442695, %v1465_v24  ;;  %v2126_v24 = vunpack.c.h.bf16 %v2170_v36 }
 0x3bb   :  { %2308 = vpow2.f32 %v1933_v52 }
 0x3be   :  { %v1466_v13 = vpop.f32.mrf.mxu0 }
 0x3bf   :  { %v1467_v57 = vadd.f32 %v2110_v63, %v1466_v13 }
 0x3c1   :  { %v1934_v48 = vmul.f32 -1.442695, %v1467_v57  ;;  %v2309_v21 = vpop.eup %2308 }
 0x3c2   :  { %v1516_v2 = vadd.f32 1.0, %v2309_v21 }
 0x3c4   :  { %v1529_v59 = vand.u32 2147483647, %v1516_v2  ;;  %v1531_v43 = vand.u32 2147483648, %v1516_v2  ;;  %vm1525_vm15 = vweird.f32 %v1516_v2 }
 0x3c6   :  { %v3262_v50 = vpop.f32.mrf.mxu0  ;;  %vm1530_vm2 = vcmp.eq.f32.partialorder %v1529_v59, 8.507059e+37  ;;  %v1532_v37 = vor.u32 1.1754944e-38, %v1531_v43 }
 0x3c7   :  { %v1470_v52 = vadd.f32 %v2113_v29, %v3262_v50 }
 0x3ce   :  { %v3264_v25 = vpop.f32.mrf.mxu0 }
 0x3cf   :  { %v1472_v57 = vadd.f32 %v2114_v9, %v3264_v25 }
 0x3d6   :  { %v1474_v62 = vpop.f32.mrf.mxu0 }
 0x3d7   :  { %v1475_v46 = vadd.f32 %v2117_v54, %v1474_v62 }
 0x3d9   :  { %v1937_v45 = vmul.f32 -1.442695, %v1475_v46 }
 0x3db   :  { %2310 = vpow2.f32 %v1937_v45 }
 0x3dc   :  { %2312 = vpow2.f32 %v1934_v48 }
 0x3dd   :  { %2314 = vrcp.f32 %v1516_v2 }
 0x3de   :  { %v1476_v3 = vpop.f32.mrf.mxu0 }
 0x3df   :  { %v1477_v4 = vadd.f32 %v2118_v6, %v1476_v3  ;;  %v1935_v3 = vmul.f32 -1.442695, %v1470_v52 }
 0x3e1   :  { %v2311_v31 = vpop.eup %2310  ;;  %v1938_v23 = vmul.f32 -1.442695, %v1477_v4 }
 0x3e2   :  { %v1592_v58 = vadd.f32 1.0, %v2311_v31  ;;  %v2313_v22 = vpop.eup %2312 }
 0x3e3   :  { %2316 = vpow2.f32 %v1938_v23  ;;  %v3266_v7 = vadd.f32 1.0, %v2313_v22  ;;  %v2315_v28 = vpop.eup %2314 }
 0x3e4   :  { %2318 = vrcp.f32 %v1592_v58  ;;  %v1521_v12 = vmul.f32 %v2315_v28, %v1516_v2  ;;  %v1607_v34 = vand.u32 2147483648, %v1592_v58  ;;  %vm1601_vm12 = vweird.f32 %v1592_v58 }
 0x3e5   :  { %2320 = vrcp.f32 %v3266_v7  ;;  %vm1526_vm13 = vweird.f32 %v2315_v28  ;;  %v1605_v38 = vand.u32 2147483647, %v1592_v58  ;;  %v1546_v4 = vand.u32 2147483648, %v3266_v7 }
 0x3e6   :  { %v3268_v51 = vpop.f32.mrf.mxu0  ;;  %v1522_v8 = vsub.f32 1.0, %v1521_v12  ;;  %v1608_v42 = vor.u32 1.1754944e-38, %v1607_v34  ;;  %vm3291_vm0 = vmor %vm1525_vm15, %vm1526_vm13  ;;  %vm1540_vm8 = vweird.f32 %v3266_v7  ;;  %v1544_v23 = vand.u32 2147483647, %v3266_v7 }
 0x3e7   :  { %vm1606_vm1 = vcmp.eq.f32.partialorder %v1605_v38, 8.507059e+37 }
 0x3e8   :  { %v1523_v0 = vmul.f32 %v2315_v28, %v1522_v8 }
 0x3e9   :  { %v2317_v15 = vpop.eup %2316 }
 0x3ea   :  { %v2319_v49 = vpop.eup %2318  ;;  %v3271_v16 = vadd.f32 1.0, %v2317_v15  ;;  %v1524_v32 = vadd.f32 %v2315_v28, %v1523_v0  ;;  %v2169_v15 = vld [vmem:[#allocation2 + $0x98] sm:$0xff]  }
 0x3eb   :  { %v1597_v5 = vmul.f32 %v2319_v49, %v1592_v58  ;;  %v3276_v26 = vpop.eup %2320  ;;  %vm1602_vm11 = vweird.f32 %v2319_v49  ;;  %v2122_v36 = vunpack.c.h.bf16 %v2169_v15 }
 0x3ec   :  { %2322 = vrcp.f32 %v3271_v16  ;;  %v1536_v1 = vmul.f32 %v3276_v26, %v3266_v7  ;;  %vm3284_vm14 = vmor %vm1601_vm12, %vm1602_vm11  ;;  %v1528_v47 = vsel %vm3291_vm0, %v2315_v28, %v1524_v32  ;;  %vm1541_vm5 = vweird.f32 %v3276_v26 }
 0x3ed   :  { %v1598_v20 = vsub.f32 1.0, %v1597_v5  ;;  %v1622_v48 = vand.u32 2147483648, %v3271_v16  ;;  %v1533_v45 = vsel %vm1530_vm2, %v1532_v37, %v1528_v47  ;;  %vm1616_vm6 = vweird.f32 %v3271_v16  ;;  %vm1542_vm9 = vmor %vm1540_vm8, %vm1541_vm5  ;;  %v2173_v37 = vld [vmem:[#allocation2 + $0xb8] sm:$0xff]  }
 0x3ee   :  { %v3274_v41 = vpop.f32.mrf.mxu0  ;;  %v1537_v11 = vsub.f32 1.0, %v1536_v1  ;;  %v1620_v25 = vand.u32 2147483647, %v3271_v16  ;;  %vm1545_vm11 = vcmp.eq.f32.partialorder %v1544_v23, 8.507059e+37  ;;  %v2121_v7 = vunpack.c.l.bf16 %v2169_v15 }
 0x3ef   :  { %v1599_v53 = vmul.f32 %v2319_v49, %v1598_v20  ;;  %v1623_v22 = vor.u32 1.1754944e-38, %v1622_v48 }
 0x3f0   :  { %v1538_v13 = vmul.f32 %v3276_v26, %v1537_v11  ;;  %vm1621_vm10 = vcmp.eq.f32.partialorder %v1620_v25, 8.507059e+37 }
 0x3f1   :  { %v1600_v40 = vadd.f32 %v2319_v49, %v1599_v53  ;;  %v1480_v53 = vadd.f32 %v2121_v7, %v3268_v51 }
 0x3f2   :  { %v3278_v55 = vpop.eup %2322  ;;  %v1539_v6 = vadd.f32 %v3276_v26, %v1538_v13 }
 0x3f3   :  { %v1612_v56 = vmul.f32 %v3278_v55, %v3271_v16  ;;  %v1604_v35 = vsel %vm3284_vm14, %v2319_v49, %v1600_v40  ;;  %vm1617_vm3 = vweird.f32 %v3278_v55  ;;  %v1547_v49 = vor.u32 1.1754944e-38, %v1546_v4 }
 0x3f4   :  { %v1609_v63 = vsel %vm1606_vm1, %v1608_v42, %v1604_v35  ;;  %vm1618_vm7 = vmor %vm1616_vm6, %vm1617_vm3  ;;  %v1543_v28 = vsel %vm1542_vm9, %v3276_v26, %v1539_v6 }
 0x3f5   :  { %v1613_v27 = vsub.f32 1.0, %v1612_v56  ;;  %v1736_v50 = vmul.f32 %v1609_v63, %v3058_v44  ;;  %v1936_v44 = vmul.f32 -1.442695, %v1472_v57  ;;  %v1548_v20 = vsel %vm1545_vm11, %v1547_v49, %v1543_v28  ;;  %v2171_v57 = vld [vmem:[#allocation2 + $0xa8] sm:$0xff]  }
 0x3f6   :  { %v1484_v18 = vpop.f32.mrf.mxu0  ;;  %v1482_v56 = vadd.f32 %v2122_v36, %v3274_v41 }
 0x3f7   :  { %v1485_v33 = vadd.f32 %v2125_v61, %v1484_v18  ;;  %v1614_v17 = vmul.f32 %v3278_v55, %v1613_v27  ;;  %v1939_v61 = vmul.f32 -1.442695, %v1480_v53 }
 0x3f8   :  { %v1940_v40 = vmul.f32 -1.442695, %v1482_v56 }
 0x3f9   :  { %2324 = vtanh.f32 %v1485_v33  ;;  %v1615_v62 = vadd.f32 %v3278_v55, %v1614_v17 }
 0x3fb   :  { %v1619_v58 = vsel %vm1618_vm7, %v3278_v55, %v1615_v62  ;;  %v2137_v62 = vunpack.c.l.bf16 %v2173_v37 }
 0x3fc   :  { %v1624_v16 = vsel %vm1621_vm10, %v1623_v22, %v1619_v58 }
 0x3fd   :  { %v1737_v8 = vmul.f32 %v1624_v16, %v3075_v30  ;;  %v2172_v30 = vld [vmem:[#allocation2 + $0xb0] sm:$0xff]  }
 0x3fe   :  { %v1486_v54 = vpop.f32.mrf.mxu0  ;;  %v2133_v51 = vunpack.c.l.bf16 %v2172_v30  ;;  %v2134_v35 = vunpack.c.h.bf16 %v2172_v30 }
 0x3ff   :  { %v2325_v46 = vpop.eup %2324  ;;  %v1487_v21 = vadd.f32 %v2126_v24, %v1486_v54 }
 0x400   :  { %v1740_v2 = vmul.f32 %v2325_v46, %v1533_v45 }
 0x401   :  { %2326 = vtanh.f32 %v1487_v21 }
 0x402   :  { %v3309_v31 = vadd.f32 %v1740_v2, %v1736_v50  ;;  %2328 = vpow2.f32 %v1935_v3  ;;  %v2129_v50 = vunpack.c.l.bf16 %v2171_v57  ;;  %v2130_v2 = vunpack.c.h.bf16 %v2171_v57 }
 0x403   :  { %2330 = vpow2.f32 %v1936_v44 }
 0x404   :  { %2332 = vpow2.f32 %v1939_v61 }
 0x406   :  { %v3317_v5 = vpop.f32.mrf.mxu0 }
 0x407   :  { %v2327_v12 = vpop.eup %2326  ;;  %v1490_v61 = vadd.f32 %v2129_v50, %v3317_v5 }
 0x408   :  { %v1741_v55 = vmul.f32 %v2327_v12, %v1548_v20  ;;  %v2329_v26 = vpop.eup %2328 }
 0x409   :  { %v2331_v0 = vpop.eup %2330  ;;  %v3326_v18 = vadd.f32 1.0, %v2329_v26  ;;  %v2138_v26 = vunpack.c.h.bf16 %v2173_v37 }
 0x40a   :  { %v3321_v1 = vadd.f32 %v1741_v55, %v1737_v8  ;;  %v3328_v11 = vadd.f32 1.0, %v2331_v0  ;;  %v2333_v41 = vpop.eup %2332 }
 0x40b   :  { %2334 = vrcp.f32 %v3326_v18  ;;  %v3336_v59 = vadd.f32 1.0, %v2333_v41  ;;  %vm1555_vm12 = vweird.f32 %v3326_v18  ;;  %v1561_v4 = vand.u32 2147483648, %v3326_v18 }
 0x40c   :  { %2336 = vpow2.f32 %v1940_v40  ;;  %v1559_v15 = vand.u32 2147483647, %v3326_v18  ;;  %v1576_v49 = vand.u32 2147483648, %v3328_v11  ;;  %vm1570_vm0 = vweird.f32 %v3328_v11 }
 0x40d   :  { %2338 = vrcp.f32 %v3328_v11  ;;  %v1574_v7 = vand.u32 2147483647, %v3328_v11  ;;  %v1562_v55 = vor.u32 1.1754944e-38, %v1561_v4  ;;  %v1637_v56 = vand.u32 2147483648, %v3336_v59 }
 0x40e   :  { %v3324_v27 = vpop.f32.mrf.mxu0  ;;  %vm1560_vm2 = vcmp.eq.f32.partialorder %v1559_v15, 8.507059e+37  ;;  %v1577_v30 = vor.u32 1.1754944e-38, %v1576_v49  ;;  %vm1631_vm5 = vweird.f32 %v3336_v59 }
 0x40f   :  { %vm1575_vm3 = vcmp.eq.f32.partialorder %v1574_v7, 8.507059e+37  ;;  %v1492_v5 = vadd.f32 %v2130_v2, %v3324_v27 }
 0x411   :  { %v3332_v60 = vpop.eup %2334 }
 0x412   :  { %v2337_v38 = vpop.eup %2336  ;;  %v1551_v43 = vmul.f32 %v3332_v60, %v3326_v18  ;;  %vm1556_vm13 = vweird.f32 %v3332_v60 }
 0x413   :  { %v3334_v14 = vpop.eup %2338  ;;  %v3340_v17 = vadd.f32 1.0, %v2337_v38  ;;  %vm3375_vm15 = vmor %vm1555_vm12, %vm1556_vm13 }
 0x414   :  { %v1566_v29 = vmul.f32 %v3334_v14, %v3328_v11  ;;  %v1552_v9 = vsub.f32 1.0, %v1551_v43  ;;  %vm1571_vm14 = vweird.f32 %v3334_v14  ;;  %v1635_v11 = vand.u32 2147483647, %v3336_v59 }
 0x415   :  { %vm3385_vm1 = vmor %vm1570_vm0, %vm1571_vm14  ;;  %v1638_v43 = vor.u32 1.1754944e-38, %v1637_v56  ;;  %vm1646_vm14 = vweird.f32 %v3340_v17 }
 0x416   :  { %v1494_v34 = vpop.f32.mrf.mxu0  ;;  %v1567_v24 = vsub.f32 1.0, %v1566_v29  ;;  %v1553_v54 = vmul.f32 %v3332_v60, %v1552_v9  ;;  %vm3408_vm7 = vcmp.eq.f32.partialorder %v1635_v11, 8.507059e+37 }
 0x417   :  { %v1495_v33 = vadd.f32 %v2133_v51, %v1494_v34 }
 0x418   :  { %v1568_v46 = vmul.f32 %v3334_v14, %v1567_v24  ;;  %v1554_v3 = vadd.f32 %v3332_v60, %v1553_v54 }
 0x419   :  { %v1941_v32 = vmul.f32 -1.442695, %v1495_v33 }
 0x41a   :  { %v1569_v44 = vadd.f32 %v3334_v14, %v1568_v46  ;;  %v1558_v8 = vsel %vm3375_vm15, %v3332_v60, %v1554_v3 }
 0x41b   :  { %2340 = vpow2.f32 %v1941_v32  ;;  %v3396_v33 = vsel %vm1560_vm2, %v1562_v55, %v1558_v8 }
 0x41c   :  { %2342 = vrcp.f32 %v3336_v59  ;;  %v1573_v18 = vsel %vm3385_vm1, %v3334_v14, %v1569_v44 }
 0x41d   :  { %2344 = vrcp.f32 %v3340_v17  ;;  %v3401_v32 = vsel %vm1575_vm3, %v1577_v30, %v1573_v18 }
 0x41e   :  { %v1496_v42 = vpop.f32.mrf.mxu0 }
 0x41f   :  { %v1497_v10 = vadd.f32 %v2134_v35, %v1496_v42  ;;  %v1652_v42 = vand.u32 2147483648, %v3340_v17 }
 0x421   :  { %v2341_v13 = vpop.eup %2340  ;;  %v1942_v47 = vmul.f32 -1.442695, %v1497_v10  ;;  %v1653_v3 = vor.u32 1.1754944e-38, %v1652_v42 }
 0x422   :  { %v3346_v52 = vadd.f32 1.0, %v2341_v13  ;;  %v3349_v63 = vpop.eup %2342 }
 0x423   :  { %2346 = vpow2.f32 %v1942_v47  ;;  %v3353_v45 = vpop.eup %2344  ;;  %v1627_v6 = vmul.f32 %v3349_v63, %v3336_v59  ;;  %vm1632_vm6 = vweird.f32 %v3349_v63 }
 0x424   :  { %2348 = vrcp.f32 %v3346_v52  ;;  %v1642_v22 = vmul.f32 %v3353_v45, %v3340_v17  ;;  %vm1647_vm9 = vweird.f32 %v3353_v45  ;;  %v1687_v24 = vand.u32 2147483648, %v3346_v52  ;;  %vm3433_vm13 = vmor %vm1631_vm5, %vm1632_vm6 }
 0x425   :  { %v1628_v12 = vsub.f32 1.0, %v1627_v6  ;;  %vm1681_vm10 = vweird.f32 %v3346_v52  ;;  %v1685_v57 = vand.u32 2147483647, %v3346_v52  ;;  %vm3445_vm15 = vmor %vm1646_vm14, %vm1647_vm9 }
 0x426   :  { %v1499_v48 = vpop.f32.mrf.mxu0  ;;  %v1643_v0 = vsub.f32 1.0, %v1642_v22  ;;  %v1688_v2 = vor.u32 1.1754944e-38, %v1687_v24  ;;  %v1763_v24 = vpop.permute.xlu2 %1762 }
 0x427   :  { %v1500_v21 = vadd.f32 %v2137_v62, %v1499_v48  ;;  %v1629_v34 = vmul.f32 %v3349_v63, %v1628_v12  ;;  %vm1686_vm1 = vcmp.eq.f32.partialorder %v1685_v57, 8.507059e+37 }
 0x428   :  { %v1644_v35 = vmul.f32 %v3353_v45, %v1643_v0 }
 0x429   :  { %v2347_v25 = vpop.eup %2346  ;;  %v1943_v23 = vmul.f32 -1.442695, %v1500_v21  ;;  %v1630_v13 = vadd.f32 %v3349_v63, %v1629_v34 }
 0x42a   :  { %v3361_v58 = vpop.eup %2348  ;;  %v3367_v28 = vadd.f32 1.0, %v2347_v25  ;;  %v1645_v37 = vadd.f32 %v3353_v45, %v1644_v35 }
 0x42b   :  { %v1677_v16 = vmul.f32 %v3361_v58, %v3346_v52  ;;  %2350 = vpow2.f32 %v1943_v23  ;;  %vm1682_vm8 = vweird.f32 %v3361_v58  ;;  %v1634_v59 = vsel %vm3433_vm13, %v3349_v63, %v1630_v13 }
 0x42c   :  { %2352 = vrcp.f32 %v3367_v28  ;;  %vm3424_vm11 = vmor %vm1681_vm10, %vm1682_vm8  ;;  %v1702_v46 = vand.u32 2147483648, %v3367_v28  ;;  %v1700_v21 = vand.u32 2147483647, %v3367_v28  ;;  %vm1696_vm0 = vweird.f32 %v3367_v28 }
 0x42d   :  { %v1678_v36 = vsub.f32 1.0, %v1677_v16  ;;  %2354 = vtanh.f32 %v1490_v61  ;;  %v1649_v4 = vsel %vm3445_vm15, %v3353_v45, %v1645_v37  ;;  %v1639_v16 = vsel %vm3408_vm7, %v1638_v43, %v1634_v59 }
 0x42e   :  { %v1501_v40 = vpop.f32.mrf.mxu0  ;;  %v1703_v15 = vor.u32 1.1754944e-38, %v1702_v46  ;;  %vm1701_vm5 = vcmp.eq.f32.partialorder %v1700_v21, 8.507059e+37 }
 0x42f   :  { %v1502_v51 = vadd.f32 %v2138_v26, %v1501_v40  ;;  %v1679_v41 = vmul.f32 %v3361_v58, %v1678_v36  ;;  %v1738_v26 = vmul.f32 %v1639_v16, %v3190_v19 }
 0x431   :  { %v2351_v60 = vpop.eup %2350  ;;  %v1944_v38 = vmul.f32 -1.442695, %v1502_v51  ;;  %v1680_v9 = vadd.f32 %v3361_v58, %v1679_v41 }
 0x432   :  { %v2353_v14 = vpop.eup %2352  ;;  %v3404_v29 = vadd.f32 1.0, %v2351_v60 }
 0x433   :  { %v1692_v27 = vmul.f32 %v2353_v14, %v3367_v28  ;;  %2356 = vpow2.f32 %v1944_v38  ;;  %vm1697_vm12 = vweird.f32 %v2353_v14  ;;  %v2355_v48 = vpop.eup %2354  ;;  %v1684_v52 = vsel %vm3424_vm11, %v3361_v58, %v1680_v9 }
 0x434   :  { %2358 = vrcp.f32 %v3404_v29  ;;  %vm3457_vm2 = vmor %vm1696_vm0, %vm1697_vm12  ;;  %v1689_v44 = vsel %vm1686_vm1, %v1688_v2, %v1684_v52  ;;  %v1742_v12 = vmul.f32 %v2355_v48, %v3396_v33  ;;  %v1717_v34 = vand.u32 2147483648, %v3404_v29 }
 0x435   :  { %2360 = vtanh.f32 %v1492_v5  ;;  %v1693_v47 = vsub.f32 1.0, %v1692_v27  ;;  %vm1711_vm7 = vweird.f32 %v3404_v29  ;;  %v1715_v41 = vand.u32 2147483647, %v3404_v29 }
 0x436   :  { %2362 = vtanh.f32 %v3309_v31  ;;  %v1746_v18 = vadd.f32 %v1742_v12, %v1738_v26 }
 0x437   :  { %2364 = vtanh.f32 %v3321_v1  ;;  %v1694_v62 = vmul.f32 %v2353_v14, %v1693_v47  ;;  %v1650_v1 = vand.u32 2147483647, %v3340_v17  ;;  %vm1716_vm11 = vcmp.eq.f32.partialorder %v1715_v41, 8.507059e+37  ;;  %v1756_v47 = vld [vmem:[%s3488_s7] sm:$0xf] }
 0x439   :  { %v2357_v6 = vpop.eup %2356  ;;  %v1695_v25 = vadd.f32 %v2353_v14, %v1694_v62  ;;  %vm1651_vm3 = vcmp.eq.f32.partialorder %v1650_v1, 8.507059e+37 }
 0x43a   :  { %v2359_v17 = vpop.eup %2358  ;;  %v1675_v23 = vadd.f32 1.0, %v2357_v6  ;;  %v1654_v20 = vsel %vm1651_vm3, %v1653_v3, %v1649_v4 }
 0x43b   :  { %v2361_v22 = vpop.eup %2360  ;;  %v1707_v63 = vmul.f32 %v2359_v17, %v3404_v29  ;;  %v1699_v28 = vsel %vm3457_vm2, %v2353_v14, %v1695_v25  ;;  %v1739_v0 = vmul.f32 %v1654_v20, %v3192_v39  ;;  %vm1712_vm6 = vweird.f32 %v2359_v17 }
 0x43c   :  { %v2363_v49 = vpop.eup %2362  ;;  %2366 = vrcp.f32 %v1675_v23  ;;  %v1704_v8 = vsel %vm1701_vm5, %v1703_v15, %v1699_v28  ;;  %v1743_v55 = vmul.f32 %v2361_v22, %v3401_v32  ;;  %vm1713_vm8 = vmor %vm1711_vm7, %vm1712_vm6  ;;  %v1732_v19 = vand.u32 2147483648, %v1675_v23 }
 0x43d   :  { %v2365_v45 = vpop.eup %2364  ;;  %v1708_v7 = vsub.f32 1.0, %v1707_v63  ;;  %v1752_v53 = vmul.f32 %v2363_v49, %v1689_v44  ;;  %2368 = vtanh.f32 %v1746_v18  ;;  %v1730_v5 = vand.u32 2147483647, %v1675_v23 }
 0x43e   :  { %v1753_v36 = vmul.f32 %v2365_v45, %v1704_v8  ;;  %v1747_v11 = vadd.f32 %v1743_v55, %v1739_v0  ;;  %v1718_v32 = vor.u32 1.1754944e-38, %v1717_v34  ;;  %vm1726_vm10 = vweird.f32 %v1675_v23 }
 0x43f   :  { %v1709_v56 = vmul.f32 %v2359_v17, %v1708_v7  ;;  %v1733_v43 = vor.u32 1.1754944e-38, %v1732_v19  ;;  %vm1731_vm13 = vcmp.eq.f32.partialorder %v1730_v5, 8.507059e+37 }
 0x440   :  { %v1757_v61 = vpack.c.bf16 %v1753_v36, %v1752_v53  ;;  %2370 = vtanh.f32 %v1747_v11 }
 0x441   :  { %v1710_v51 = vadd.f32 %v2359_v17, %v1709_v56 }
 0x442   :  { %v2367_v40 = vpop.eup %2366 }
 0x443   :  { %v1722_v30 = vmul.f32 %v2367_v40, %v1675_v23  ;;  %v1714_v39 = vsel %vm1713_vm8, %v2359_v17, %v1710_v51  ;;  %vm1727_vm9 = vweird.f32 %v2367_v40  ;;  %v2369_v35 = vpop.eup %2368 }
 0x444   :  { %v1719_v14 = vsel %vm1716_vm11, %v1718_v32, %v1714_v39  ;;  %vm1728_vm12 = vmor %vm1726_vm10, %vm1727_vm9 }
 0x445   :  { %v1723_v33 = vsub.f32 1.0, %v1722_v30  ;;  %v1754_v29 = vmul.f32 %v2369_v35, %v1719_v14 }
 0x446   :  { %v2371_v10 = vpop.eup %2370 }
 0x447   :  { %v1724_v60 = vmul.f32 %v2367_v40, %v1723_v33 }
 0x449   :  { %v1725_v38 = vadd.f32 %v2367_v40, %v1724_v60 }
 0x44b   :  { %v1729_v42 = vsel %vm1728_vm12, %v2367_v40, %v1725_v38 }
 0x44c   :  { %v1734_v27 = vsel %vm1731_vm13, %v1733_v43, %v1729_v42 }
 0x44d   :  { %v1755_v13 = vmul.f32 %v2371_v10, %v1734_v27 }
 0x44f   :  { %v1758_v9 = vpack.c.bf16 %v1755_v13, %v1754_v29 }
 0x451   :  { %1774 = vmatpush.bf16.msra.mxu1 %v1758_v9 }
 0x455   :  { %1775 = vmatpush.bf16.msra.mxu1 %v1757_v61 }
 0x458   :  { %1945 = vmatmul.msk.bf16.vlgmr.msra.gmra.mxu1 %vm760_vm4, %v1756_v47 }
 0x4d5   :  { %v1777_v37 = vpop.f32.mrf.mxu1 }
 0x4d6   :  { %v1778_v57 = vadd.f32 %v1777_v37, %v1763_v24 }
 0x4d8   :  { %1781 = vst [vmem:[%s3489_s9] sm:$0xff] %v1778_v57 }
 0x4dd   :  { %v1779_v54 = vpop.f32.mrf.mxu1 }

</bundles_post_ra>
